<compile_context>
chip_gen: v7x
topology: tpu7x:2x2x1
jax: 0.10.0
libtpu: 0.0.40
codegen_flags: <defaults>
</compile_context>

<pallas_src>
import math

import jax
import jax.numpy as jnp
from jax import lax
from jax.experimental import pallas as pl
from jax.experimental.pallas import tpu as pltpu

NUM_HEADS = 8
LN_EPS = 1e-5
NEG_MASK = -1e9   # PyTorch uses -inf key padding; -1e9 avoids NaN for fully-masked
                  # rows and matches the attentive-pooling masking constant.
CPAD = 128        # classifier widths padded to one full lane tile


def _mxu(a_bf16, w_bf16):
    # MXU matmul: bf16 operands, f32 accumulation.
    return jnp.dot(a_bf16, w_bf16, preferred_element_type=jnp.float32)


def context_attention_kernel(
    text_ref, ctx_ref, tmask_ref, cmask_ref,
    wq_ref, bq_ref, wk_ref, bk_ref, wv_ref, bv_ref, wo_ref, bo_ref,
    wgt_ref, wga_ref, bg_ref, ln_g_ref, ln_b_ref,
    wp1_ref, bp1_ref, wp2t_ref, bp2_ref,
    wc1_ref, bc1_ref, wc2_ref, bc2_ref, wc3_ref, bc3_ref,
    out_ref,
):
    # One grid step == one batch example.
    _, St, H = text_ref.shape
    Sc = ctx_ref.shape[1]
    hd = H // NUM_HEADS

    text = text_ref[0]          # (St, H) f32
    ctx = ctx_ref[0]            # (Sc, H) f32
    tmask = tmask_ref[0]        # (St, 1)
    cmask = cmask_ref[0]        # (1, Sc)

    text_b = text.astype(jnp.bfloat16)
    ctx_b = ctx.astype(jnp.bfloat16)

    # ---- Q/K/V projections (1/sqrt(hd) folded into wq/bq by the wrapper) ----
    q = _mxu(text_b, wq_ref[...]) + bq_ref[...]     # (St, H)
    k = _mxu(ctx_b, wk_ref[...]) + bk_ref[...]      # (Sc, H)
    v = _mxu(ctx_b, wv_ref[...]) + bv_ref[...]      # (Sc, H)
    qb = q.astype(jnp.bfloat16)                     # cast once, reused by all heads
    kb = k.astype(jnp.bfloat16)
    vb = v.astype(jnp.bfloat16)

    # Key-padding additive bias: (1, Sc), broadcast over query rows.
    kbias = jnp.where(cmask > 0.0, 0.0, NEG_MASK).astype(jnp.float32)

    # ---- block-diagonal multi-head cross-attention: per-head (St,Sc) scores only ----
    head_outs = []
    for h in range(NUM_HEADS):
        lo = h * hd
        qh = qb[:, lo:lo + hd]
        kh = kb[:, lo:lo + hd]
        vh = vb[:, lo:lo + hd]
        s = lax.dot_general(qh, kh, (((1,), (1,)), ((), ())),
                            preferred_element_type=jnp.float32) + kbias    # (St, Sc)
        m = jnp.max(s, axis=-1, keepdims=True)
        e = jnp.exp(s - m)
        p = e * pl.reciprocal(jnp.sum(e, axis=-1, keepdims=True), approx=True)
        head_outs.append(jnp.dot(p.astype(jnp.bfloat16), vh,
                                 preferred_element_type=jnp.float32))      # (St, hd)
    o = jnp.concatenate(head_outs, axis=1)          # (St, H)

    attended = _mxu(o.astype(jnp.bfloat16), wo_ref[...]) + bo_ref[...]
    attended_b = attended.astype(jnp.bfloat16)

    # ---- fusion gate (no concat: wg split into text / attended halves), LayerNorm ----
    gate = jax.nn.sigmoid(_mxu(text_b, wgt_ref[...])
                          + _mxu(attended_b, wga_ref[...]) + bg_ref[...])
    fused = text + gate * attended
    mu = jnp.mean(fused, axis=-1, keepdims=True)
    var = jnp.mean(jnp.square(fused - mu), axis=-1, keepdims=True)
    normed = (fused - mu) * lax.rsqrt(var + LN_EPS) * ln_g_ref[...] + ln_b_ref[...]
    normed_b = normed.astype(jnp.bfloat16)

    # ---- attentive pooling (score via lane multiply-reduce, softmax over St) ----
    hmid = jnp.tanh(_mxu(normed_b, wp1_ref[...]) + bp1_ref[...])                 # (St, H/2)
    sc = jnp.sum(hmid * wp2t_ref[...], axis=-1, keepdims=True) + bp2_ref[...]    # (St, 1)
    sc = jnp.where(tmask == 0.0, NEG_MASK, sc)
    mx = jnp.max(sc, axis=0, keepdims=True)
    ex = jnp.exp(sc - mx)
    pw = ex * pl.reciprocal(jnp.sum(ex, axis=0, keepdims=True), approx=True)     # (St, 1)
    pooled = jnp.sum(normed * pw, axis=0, keepdims=True)                         # (1, H)

    # ---- classifier head (widths padded to 128 lanes; logits sliced in wrapper) ----
    z = jnp.maximum(_mxu(pooled.astype(jnp.bfloat16), wc1_ref[...]) + bc1_ref[...], 0.0)
    z = jnp.maximum(_mxu(z.astype(jnp.bfloat16), wc2_ref[...]) + bc2_ref[...], 0.0)
    out_ref[0] = _mxu(z.astype(jnp.bfloat16), wc3_ref[...]) + bc3_ref[...]


def context_attention_forward(text_emb, ctx_emb, input_mask, context_mask, params):
    B, St, H = text_emb.shape
    _, Sc, _ = ctx_emb.shape
    C = params["wc3"].shape[1]
    scale = 1.0 / math.sqrt(H // NUM_HEADS)

    def bf(w):
        return w.astype(jnp.bfloat16)

    def pad2(w, rows, cols):
        return jnp.zeros((rows, cols), w.dtype).at[:w.shape[0], :w.shape[1]].set(w)

    wg = params["wg"]   # (2H, H) -> split so the concat never materializes in-kernel
    args = (
        text_emb,                              # (B, St, H)
        ctx_emb,                               # (B, Sc, H)
        input_mask.reshape(B, St, 1),          # per-example (St, 1) column
        context_mask.reshape(B, 1, Sc),        # per-example (1, Sc) row
        bf(params["wq"] * scale), params["bq"] * scale,   # 1/sqrt(hd) folded into Q proj
        bf(params["wk"]), params["bk"],
        bf(params["wv"]), params["bv"],
        bf(params["wo"]), params["bo"],
        bf(wg[:H, :]), bf(wg[H:, :]), params["bg"],
        params["ln_g"], params["ln_b"],
        bf(params["wp1"]), params["bp1"],
        params["wp2"].T, params["bp2"],                   # (1, H/2): lane-reduce weight (f32)
        bf(pad2(params["wc1"], H, CPAD)), pad2(params["bc1"], 1, CPAD),
        bf(pad2(params["wc2"], CPAD, CPAD)), pad2(params["bc2"], 1, CPAD),
        bf(pad2(params["wc3"], CPAD, CPAD)), pad2(params["bc3"], 1, CPAD),
    )

    data_specs = [
        pl.BlockSpec((1, St, H), lambda b: (b, 0, 0)),
        pl.BlockSpec((1, Sc, H), lambda b: (b, 0, 0)),
        pl.BlockSpec((1, St, 1), lambda b: (b, 0, 0)),
        pl.BlockSpec((1, 1, Sc), lambda b: (b, 0, 0)),
    ]
    # All weights: full-array blocks, constant index_map -> VMEM-resident across the grid.
    weight_specs = [pl.BlockSpec(a.shape, lambda b: (0, 0)) for a in args[4:]]

    out = pl.pallas_call(
        context_attention_kernel,
        out_shape=jax.ShapeDtypeStruct((B, 1, CPAD), jnp.float32),
        grid=(B,),
        in_specs=data_specs + weight_specs,
        out_specs=pl.BlockSpec((1, 1, CPAD), lambda b: (b, 0, 0)),
        compiler_params=pltpu.CompilerParams(dimension_semantics=("parallel",)),
    )(*args)
    return out[:, 0, :C]


def ref_forward(params, text_emb, ctx_emb, input_mask, context_mask):
    """Plain-JAX f32 reference (mirrors the PyTorch post-encoder forward)."""
    B, St, H = text_emb.shape
    hd = H // NUM_HEADS
    scale = 1.0 / math.sqrt(hd)
    q = text_emb @ params["wq"] + params["bq"]
    k = ctx_emb @ params["wk"] + params["bk"]
    v = ctx_emb @ params["wv"] + params["bv"]
    qh = q.reshape(B, St, NUM_HEADS, hd)
    kh = k.reshape(B, -1, NUM_HEADS, hd)
    vh = v.reshape(B, -1, NUM_HEADS, hd)
    s = jnp.einsum("bqnd,bknd->bnqk", qh, kh) * scale
    s = s + jnp.where(context_mask[:, None, None, :] == 0.0, NEG_MASK, 0.0)
    p = jax.nn.softmax(s, axis=-1)
    attended = jnp.einsum("bnqk,bknd->bqnd", p, vh).reshape(B, St, H)
    attended = attended @ params["wo"] + params["bo"]
    gate_in = jnp.concatenate([text_emb, attended], axis=-1)
    gate = jax.nn.sigmoid(gate_in @ params["wg"] + params["bg"])
    fused = text_emb + gate * attended
    mu = fused.mean(-1, keepdims=True)
    var = ((fused - mu) ** 2).mean(-1, keepdims=True)
    normed = (fused - mu) * lax.rsqrt(var + LN_EPS) * params["ln_g"] + params["ln_b"]
    sc = (jnp.tanh(normed @ params["wp1"] + params["bp1"]) @ params["wp2"]
          + params["bp2"])[..., 0]
    sc = jnp.where(input_mask == 0.0, NEG_MASK, sc)
    w = jax.nn.softmax(sc, axis=1)
    pooled = jnp.sum(normed * w[..., None], axis=1)
    z = jnp.maximum(pooled @ params["wc1"] + params["bc1"], 0.0)
    z = jnp.maximum(z @ params["wc2"] + params["bc2"], 0.0)
    return z @ params["wc3"] + params["bc3"]


if __name__ == "__main__":
    B, S_TEXT, S_CTX, H, C, VOCAB = 2, 8, 8, 32, 3, 50
    HID1, HID2 = 100, 50

    keys = jax.random.split(jax.random.PRNGKey(0), 32)

    def w(i, shape, scale=0.2):
        return jax.random.normal(keys[i], shape, jnp.float32) * scale

    params = dict(
        wq=w(0, (H, H)), bq=w(1, (1, H)),
        wk=w(2, (H, H)), bk=w(3, (1, H)),
        wv=w(4, (H, H)), bv=w(5, (1, H)),
        wo=w(6, (H, H)), bo=w(7, (1, H)),
        wg=w(8, (2 * H, H)), bg=w(9, (1, H)),
        ln_g=jnp.ones((1, H), jnp.float32), ln_b=jnp.zeros((1, H), jnp.float32),
        wp1=w(10, (H, H // 2)), bp1=w(11, (1, H // 2)),
        wp2=w(12, (H // 2, 1)), bp2=w(13, (1, 1)),
        wc1=w(14, (H, HID1)), bc1=w(15, (1, HID1)),
        wc2=w(16, (HID1, HID2)), bc2=w(17, (1, HID2)),
        wc3=w(18, (HID2, C)), bc3=w(19, (1, C)),
    )

    # TODO(synk): pretrained HuggingFace transformer encoder has no Pallas equivalent;
    # replaced by a deterministic embedding-table lookup stand-in (plain-JAX glue).
    emb_table = w(20, (VOCAB, H), scale=1.0)
    input_ids = jax.random.randint(keys[21], (B, S_TEXT), 0, VOCAB)
    context_ids = jax.random.randint(keys[22], (B, S_CTX), 0, VOCAB)
    input_mask = jnp.array([[1.0] * S_TEXT,
                            [1.0] * 5 + [0.0] * (S_TEXT - 5)], jnp.float32)
    context_mask = jnp.array([[1.0] * S_CTX,
                              [1.0] * 6 + [0.0] * (S_CTX - 6)], jnp.float32)
    text_emb = jnp.take(emb_table, input_ids, axis=0)   # (B, S_TEXT, H)
    ctx_emb = jnp.take(emb_table, context_ids, axis=0)  # (B, S_CTX, H)

    logits = context_attention_forward(text_emb, ctx_emb, input_mask, context_mask, params)
    logits = jax.block_until_ready(logits)

    ref = ref_forward(params, text_emb, ctx_emb, input_mask, context_mask)
    assert logits.shape == (B, C)
    # Kernel uses bf16 MXU operands (f32 accumulate) + approx reciprocal; reference is
    # pure f32, so allow a mixed-precision tolerance.
    assert bool(jnp.allclose(logits, ref, rtol=5e-2, atol=5e-2)), (logits, ref)
    print("KERNEL_OK")
</pallas_src>

<mosaic_0001>
module attributes {stable_mosaic.version = 11 : i64} {
  func.func @context_attention_kernel(%arg0: i32, %arg1: memref<1x8x32xf32, #tpu.memory_space<vmem>>, %arg2: memref<1x8x32xf32, #tpu.memory_space<vmem>>, %arg3: memref<1x8x1xf32, #tpu.memory_space<vmem>>, %arg4: memref<1x1x8xf32, #tpu.memory_space<vmem>>, %arg5: memref<32x32xbf16, #tpu.memory_space<vmem>>, %arg6: memref<1x32xf32, #tpu.memory_space<vmem>>, %arg7: memref<32x32xbf16, #tpu.memory_space<vmem>>, %arg8: memref<1x32xf32, #tpu.memory_space<vmem>>, %arg9: memref<32x32xbf16, #tpu.memory_space<vmem>>, %arg10: memref<1x32xf32, #tpu.memory_space<vmem>>, %arg11: memref<32x32xbf16, #tpu.memory_space<vmem>>, %arg12: memref<1x32xf32, #tpu.memory_space<vmem>>, %arg13: memref<32x32xbf16, #tpu.memory_space<vmem>>, %arg14: memref<32x32xbf16, #tpu.memory_space<vmem>>, %arg15: memref<1x32xf32, #tpu.memory_space<vmem>>, %arg16: memref<1x32xf32, #tpu.memory_space<vmem>>, %arg17: memref<1x32xf32, #tpu.memory_space<vmem>>, %arg18: memref<32x16xbf16, #tpu.memory_space<vmem>>, %arg19: memref<1x16xf32, #tpu.memory_space<vmem>>, %arg20: memref<1x16xf32, #tpu.memory_space<vmem>>, %arg21: memref<1x1xf32, #tpu.memory_space<vmem>>, %arg22: memref<32x128xbf16, #tpu.memory_space<vmem>>, %arg23: memref<1x128xf32, #tpu.memory_space<vmem>>, %arg24: memref<128x128xbf16, #tpu.memory_space<vmem>>, %arg25: memref<1x128xf32, #tpu.memory_space<vmem>>, %arg26: memref<128x128xbf16, #tpu.memory_space<vmem>>, %arg27: memref<1x128xf32, #tpu.memory_space<vmem>>, %arg28: memref<1x1x128xf32, #tpu.memory_space<vmem>>) attributes {dimension_semantics = [#tpu.dimension_semantics<parallel>], iteration_bounds = array<i64: 2>, scalar_prefetch = 0 : i64, scratch_operands = 0 : i64, tpu.core_type = #tpu.core_type<tc>, window_params = [{transform_indices = @transform_0, window_bounds = array<i64: 1, 8, 32>}, {transform_indices = @transform_1, window_bounds = array<i64: 1, 8, 32>}, {transform_indices = @transform_2, window_bounds = array<i64: 1, 8, 1>}, {transform_indices = @transform_3, window_bounds = array<i64: 1, 1, 8>}, {pipeline_mode = #tpu.pipeline_mode<synchronous>, transform_indices = @transform_4, window_bounds = array<i64: 32, 32>}, {pipeline_mode = #tpu.pipeline_mode<synchronous>, transform_indices = @transform_5, window_bounds = array<i64: 1, 32>}, {pipeline_mode = #tpu.pipeline_mode<synchronous>, transform_indices = @transform_6, window_bounds = array<i64: 32, 32>}, {pipeline_mode = #tpu.pipeline_mode<synchronous>, transform_indices = @transform_7, window_bounds = array<i64: 1, 32>}, {pipeline_mode = #tpu.pipeline_mode<synchronous>, transform_indices = @transform_8, window_bounds = array<i64: 32, 32>}, {pipeline_mode = #tpu.pipeline_mode<synchronous>, transform_indices = @transform_9, window_bounds = array<i64: 1, 32>}, {pipeline_mode = #tpu.pipeline_mode<synchronous>, transform_indices = @transform_10, window_bounds = array<i64: 32, 32>}, {pipeline_mode = #tpu.pipeline_mode<synchronous>, transform_indices = @transform_11, window_bounds = array<i64: 1, 32>}, {pipeline_mode = #tpu.pipeline_mode<synchronous>, transform_indices = @transform_12, window_bounds = array<i64: 32, 32>}, {pipeline_mode = #tpu.pipeline_mode<synchronous>, transform_indices = @transform_13, window_bounds = array<i64: 32, 32>}, {pipeline_mode = #tpu.pipeline_mode<synchronous>, transform_indices = @transform_14, window_bounds = array<i64: 1, 32>}, {pipeline_mode = #tpu.pipeline_mode<synchronous>, transform_indices = @transform_15, window_bounds = array<i64: 1, 32>}, {pipeline_mode = #tpu.pipeline_mode<synchronous>, transform_indices = @transform_16, window_bounds = array<i64: 1, 32>}, {pipeline_mode = #tpu.pipeline_mode<synchronous>, transform_indices = @transform_17, window_bounds = array<i64: 32, 16>}, {pipeline_mode = #tpu.pipeline_mode<synchronous>, transform_indices = @transform_18, window_bounds = array<i64: 1, 16>}, {pipeline_mode = #tpu.pipeline_mode<synchronous>, transform_indices = @transform_19, window_bounds = array<i64: 1, 16>}, {pipeline_mode = #tpu.pipeline_mode<synchronous>, transform_indices = @transform_20, window_bounds = array<i64: 1, 1>}, {pipeline_mode = #tpu.pipeline_mode<synchronous>, transform_indices = @transform_21, window_bounds = array<i64: 32, 128>}, {pipeline_mode = #tpu.pipeline_mode<synchronous>, transform_indices = @transform_22, window_bounds = array<i64: 1, 128>}, {pipeline_mode = #tpu.pipeline_mode<synchronous>, transform_indices = @transform_23, window_bounds = array<i64: 128, 128>}, {pipeline_mode = #tpu.pipeline_mode<synchronous>, transform_indices = @transform_24, window_bounds = array<i64: 1, 128>}, {pipeline_mode = #tpu.pipeline_mode<synchronous>, transform_indices = @transform_25, window_bounds = array<i64: 128, 128>}, {pipeline_mode = #tpu.pipeline_mode<synchronous>, transform_indices = @transform_26, window_bounds = array<i64: 1, 128>}, {transform_indices = @transform_27, window_bounds = array<i64: 1, 1, 128>}]} {
    %c0 = arith.constant 0 : index
    %c0_0 = arith.constant 0 : index
    %c0_1 = arith.constant 0 : index
    %0 = vector.load %arg1[%c0, %c0_0, %c0_1] : memref<1x8x32xf32, #tpu.memory_space<vmem>>, vector<1x8x32xf32>
    %1 = vector.shape_cast %0 : vector<1x8x32xf32> to vector<8x32xf32>
    %c0_2 = arith.constant 0 : index
    %c0_3 = arith.constant 0 : index
    %c0_4 = arith.constant 0 : index
    %2 = vector.load %arg2[%c0_2, %c0_3, %c0_4] : memref<1x8x32xf32, #tpu.memory_space<vmem>>, vector<1x8x32xf32>
    %3 = vector.shape_cast %2 : vector<1x8x32xf32> to vector<8x32xf32>
    %c0_5 = arith.constant 0 : index
    %c0_6 = arith.constant 0 : index
    %c0_7 = arith.constant 0 : index
    %4 = vector.load %arg3[%c0_5, %c0_6, %c0_7] : memref<1x8x1xf32, #tpu.memory_space<vmem>>, vector<1x8x1xf32>
    %5 = vector.shape_cast %4 : vector<1x8x1xf32> to vector<8x1xf32>
    %c0_8 = arith.constant 0 : index
    %c0_9 = arith.constant 0 : index
    %c0_10 = arith.constant 0 : index
    %6 = vector.load %arg4[%c0_8, %c0_9, %c0_10] : memref<1x1x8xf32, #tpu.memory_space<vmem>>, vector<1x1x8xf32>
    %7 = vector.shape_cast %6 : vector<1x1x8xf32> to vector<1x8xf32>
    %8 = arith.truncf %1 : vector<8x32xf32> to vector<8x32xbf16>
    %9 = arith.truncf %3 : vector<8x32xf32> to vector<8x32xbf16>
    %c0_11 = arith.constant 0 : index
    %c0_12 = arith.constant 0 : index
    %10 = vector.load %arg5[%c0_11, %c0_12] : memref<32x32xbf16, #tpu.memory_space<vmem>>, vector<32x32xbf16>
    %cst = arith.constant dense<0.000000e+00> : vector<8x32xf32>
    %11 = tpu.matmul %8, %10, %cst {dimension_numbers = #tpu.dot_dimension_numbers<[1], [0], [0], [1], [0, 0, 1, 1], [], []>} : vector<8x32xbf16>, vector<32x32xbf16>, vector<8x32xf32> -> vector<8x32xf32>
    %c0_13 = arith.constant 0 : index
    %c0_14 = arith.constant 0 : index
    %12 = vector.load %arg6[%c0_13, %c0_14] : memref<1x32xf32, #tpu.memory_space<vmem>>, vector<1x32xf32>
    %13 = vector.broadcast %12 : vector<1x32xf32> to vector<8x32xf32>
    %14 = arith.addf %11, %13 : vector<8x32xf32>
    %c0_15 = arith.constant 0 : index
    %c0_16 = arith.constant 0 : index
    %15 = vector.load %arg7[%c0_15, %c0_16] : memref<32x32xbf16, #tpu.memory_space<vmem>>, vector<32x32xbf16>
    %cst_17 = arith.constant dense<0.000000e+00> : vector<8x32xf32>
    %16 = tpu.matmul %9, %15, %cst_17 {dimension_numbers = #tpu.dot_dimension_numbers<[1], [0], [0], [1], [0, 0, 1, 1], [], []>} : vector<8x32xbf16>, vector<32x32xbf16>, vector<8x32xf32> -> vector<8x32xf32>
    %c0_18 = arith.constant 0 : index
    %c0_19 = arith.constant 0 : index
    %17 = vector.load %arg8[%c0_18, %c0_19] : memref<1x32xf32, #tpu.memory_space<vmem>>, vector<1x32xf32>
    %18 = vector.broadcast %17 : vector<1x32xf32> to vector<8x32xf32>
    %19 = arith.addf %16, %18 : vector<8x32xf32>
    %c0_20 = arith.constant 0 : index
    %c0_21 = arith.constant 0 : index
    %20 = vector.load %arg9[%c0_20, %c0_21] : memref<32x32xbf16, #tpu.memory_space<vmem>>, vector<32x32xbf16>
    %cst_22 = arith.constant dense<0.000000e+00> : vector<8x32xf32>
    %21 = tpu.matmul %9, %20, %cst_22 {dimension_numbers = #tpu.dot_dimension_numbers<[1], [0], [0], [1], [0, 0, 1, 1], [], []>} : vector<8x32xbf16>, vector<32x32xbf16>, vector<8x32xf32> -> vector<8x32xf32>
    %c0_23 = arith.constant 0 : index
    %c0_24 = arith.constant 0 : index
    %22 = vector.load %arg10[%c0_23, %c0_24] : memref<1x32xf32, #tpu.memory_space<vmem>>, vector<1x32xf32>
    %23 = vector.broadcast %22 : vector<1x32xf32> to vector<8x32xf32>
    %24 = arith.addf %21, %23 : vector<8x32xf32>
    %25 = arith.truncf %14 : vector<8x32xf32> to vector<8x32xbf16>
    %26 = arith.truncf %19 : vector<8x32xf32> to vector<8x32xbf16>
    %27 = arith.truncf %24 : vector<8x32xf32> to vector<8x32xbf16>
    %cst_25 = arith.constant 0.000000e+00 : f32
    %28 = vector.broadcast %cst_25 : f32 to vector<1x8xf32>
    %29 = arith.cmpf ogt, %7, %28 : vector<1x8xf32>
    %cst_26 = arith.constant 0.000000e+00 : f32
    %cst_27 = arith.constant -1.000000e+09 : f32
    %30 = vector.broadcast %cst_26 : f32 to vector<1x8xf32>
    %31 = vector.broadcast %cst_27 : f32 to vector<1x8xf32>
    %32 = arith.select %29, %30, %31 : vector<1x8xi1>, vector<1x8xf32>
    %33 = vector.extract_strided_slice %25 {offsets = [0, 0], sizes = [8, 4], strides = [1, 1]} : vector<8x32xbf16> to vector<8x4xbf16>
    %34 = vector.extract_strided_slice %26 {offsets = [0, 0], sizes = [8, 4], strides = [1, 1]} : vector<8x32xbf16> to vector<8x4xbf16>
    %35 = vector.extract_strided_slice %27 {offsets = [0, 0], sizes = [8, 4], strides = [1, 1]} : vector<8x32xbf16> to vector<8x4xbf16>
    %cst_28 = arith.constant dense<0.000000e+00> : vector<8x8xf32>
    %36 = tpu.matmul %33, %34, %cst_28 {dimension_numbers = #tpu.dot_dimension_numbers<[1], [1], [0], [0], [0, 0, 1, 0], [], []>} : vector<8x4xbf16>, vector<8x4xbf16>, vector<8x8xf32> -> vector<8x8xf32>
    %37 = vector.broadcast %32 : vector<1x8xf32> to vector<8x8xf32>
    %38 = arith.addf %36, %37 : vector<8x8xf32>
    %cst_29 = arith.constant dense<0xFF800000> : vector<8xf32>
    %39 = vector.multi_reduction <maximumf>, %38, %cst_29 [1] : vector<8x8xf32> to vector<8xf32>
    %40 = vector.shape_cast %39 : vector<8xf32> to vector<8x1xf32>
    %41 = vector.broadcast %40 : vector<8x1xf32> to vector<8x8xf32>
    %42 = arith.subf %38, %41 : vector<8x8xf32>
    %43 = math.exp %42 : vector<8x8xf32>
    %cst_30 = arith.constant dense<0.000000e+00> : vector<8xf32>
    %44 = vector.multi_reduction <add>, %43, %cst_30 [1] : vector<8x8xf32> to vector<8xf32>
    %45 = vector.shape_cast %44 : vector<8xf32> to vector<8x1xf32>
    %46 = tpu.reciprocal %45 {approx = true} : vector<8x1xf32> -> vector<8x1xf32>
    %47 = vector.broadcast %46 : vector<8x1xf32> to vector<8x8xf32>
    %48 = arith.mulf %43, %47 : vector<8x8xf32>
    %49 = arith.truncf %48 : vector<8x8xf32> to vector<8x8xbf16>
    %cst_31 = arith.constant dense<0.000000e+00> : vector<8x4xf32>
    %50 = tpu.matmul %49, %35, %cst_31 {dimension_numbers = #tpu.dot_dimension_numbers<[1], [0], [0], [1], [0, 0, 1, 1], [], []>} : vector<8x8xbf16>, vector<8x4xbf16>, vector<8x4xf32> -> vector<8x4xf32>
    %51 = vector.extract_strided_slice %25 {offsets = [0, 4], sizes = [8, 4], strides = [1, 1]} : vector<8x32xbf16> to vector<8x4xbf16>
    %52 = vector.extract_strided_slice %26 {offsets = [0, 4], sizes = [8, 4], strides = [1, 1]} : vector<8x32xbf16> to vector<8x4xbf16>
    %53 = vector.extract_strided_slice %27 {offsets = [0, 4], sizes = [8, 4], strides = [1, 1]} : vector<8x32xbf16> to vector<8x4xbf16>
    %cst_32 = arith.constant dense<0.000000e+00> : vector<8x8xf32>
    %54 = tpu.matmul %51, %52, %cst_32 {dimension_numbers = #tpu.dot_dimension_numbers<[1], [1], [0], [0], [0, 0, 1, 0], [], []>} : vector<8x4xbf16>, vector<8x4xbf16>, vector<8x8xf32> -> vector<8x8xf32>
    %55 = vector.broadcast %32 : vector<1x8xf32> to vector<8x8xf32>
    %56 = arith.addf %54, %55 : vector<8x8xf32>
    %cst_33 = arith.constant dense<0xFF800000> : vector<8xf32>
    %57 = vector.multi_reduction <maximumf>, %56, %cst_33 [1] : vector<8x8xf32> to vector<8xf32>
    %58 = vector.shape_cast %57 : vector<8xf32> to vector<8x1xf32>
    %59 = vector.broadcast %58 : vector<8x1xf32> to vector<8x8xf32>
    %60 = arith.subf %56, %59 : vector<8x8xf32>
    %61 = math.exp %60 : vector<8x8xf32>
    %cst_34 = arith.constant dense<0.000000e+00> : vector<8xf32>
    %62 = vector.multi_reduction <add>, %61, %cst_34 [1] : vector<8x8xf32> to vector<8xf32>
    %63 = vector.shape_cast %62 : vector<8xf32> to vector<8x1xf32>
    %64 = tpu.reciprocal %63 {approx = true} : vector<8x1xf32> -> vector<8x1xf32>
    %65 = vector.broadcast %64 : vector<8x1xf32> to vector<8x8xf32>
    %66 = arith.mulf %61, %65 : vector<8x8xf32>
    %67 = arith.truncf %66 : vector<8x8xf32> to vector<8x8xbf16>
    %cst_35 = arith.constant dense<0.000000e+00> : vector<8x4xf32>
    %68 = tpu.matmul %67, %53, %cst_35 {dimension_numbers = #tpu.dot_dimension_numbers<[1], [0], [0], [1], [0, 0, 1, 1], [], []>} : vector<8x8xbf16>, vector<8x4xbf16>, vector<8x4xf32> -> vector<8x4xf32>
    %69 = vector.extract_strided_slice %25 {offsets = [0, 8], sizes = [8, 4], strides = [1, 1]} : vector<8x32xbf16> to vector<8x4xbf16>
    %70 = vector.extract_strided_slice %26 {offsets = [0, 8], sizes = [8, 4], strides = [1, 1]} : vector<8x32xbf16> to vector<8x4xbf16>
    %71 = vector.extract_strided_slice %27 {offsets = [0, 8], sizes = [8, 4], strides = [1, 1]} : vector<8x32xbf16> to vector<8x4xbf16>
    %cst_36 = arith.constant dense<0.000000e+00> : vector<8x8xf32>
    %72 = tpu.matmul %69, %70, %cst_36 {dimension_numbers = #tpu.dot_dimension_numbers<[1], [1], [0], [0], [0, 0, 1, 0], [], []>} : vector<8x4xbf16>, vector<8x4xbf16>, vector<8x8xf32> -> vector<8x8xf32>
    %73 = vector.broadcast %32 : vector<1x8xf32> to vector<8x8xf32>
    %74 = arith.addf %72, %73 : vector<8x8xf32>
    %cst_37 = arith.constant dense<0xFF800000> : vector<8xf32>
    %75 = vector.multi_reduction <maximumf>, %74, %cst_37 [1] : vector<8x8xf32> to vector<8xf32>
    %76 = vector.shape_cast %75 : vector<8xf32> to vector<8x1xf32>
    %77 = vector.broadcast %76 : vector<8x1xf32> to vector<8x8xf32>
    %78 = arith.subf %74, %77 : vector<8x8xf32>
    %79 = math.exp %78 : vector<8x8xf32>
    %cst_38 = arith.constant dense<0.000000e+00> : vector<8xf32>
    %80 = vector.multi_reduction <add>, %79, %cst_38 [1] : vector<8x8xf32> to vector<8xf32>
    %81 = vector.shape_cast %80 : vector<8xf32> to vector<8x1xf32>
    %82 = tpu.reciprocal %81 {approx = true} : vector<8x1xf32> -> vector<8x1xf32>
    %83 = vector.broadcast %82 : vector<8x1xf32> to vector<8x8xf32>
    %84 = arith.mulf %79, %83 : vector<8x8xf32>
    %85 = arith.truncf %84 : vector<8x8xf32> to vector<8x8xbf16>
    %cst_39 = arith.constant dense<0.000000e+00> : vector<8x4xf32>
    %86 = tpu.matmul %85, %71, %cst_39 {dimension_numbers = #tpu.dot_dimension_numbers<[1], [0], [0], [1], [0, 0, 1, 1], [], []>} : vector<8x8xbf16>, vector<8x4xbf16>, vector<8x4xf32> -> vector<8x4xf32>
    %87 = vector.extract_strided_slice %25 {offsets = [0, 12], sizes = [8, 4], strides = [1, 1]} : vector<8x32xbf16> to vector<8x4xbf16>
    %88 = vector.extract_strided_slice %26 {offsets = [0, 12], sizes = [8, 4], strides = [1, 1]} : vector<8x32xbf16> to vector<8x4xbf16>
    %89 = vector.extract_strided_slice %27 {offsets = [0, 12], sizes = [8, 4], strides = [1, 1]} : vector<8x32xbf16> to vector<8x4xbf16>
    %cst_40 = arith.constant dense<0.000000e+00> : vector<8x8xf32>
    %90 = tpu.matmul %87, %88, %cst_40 {dimension_numbers = #tpu.dot_dimension_numbers<[1], [1], [0], [0], [0, 0, 1, 0], [], []>} : vector<8x4xbf16>, vector<8x4xbf16>, vector<8x8xf32> -> vector<8x8xf32>
    %91 = vector.broadcast %32 : vector<1x8xf32> to vector<8x8xf32>
    %92 = arith.addf %90, %91 : vector<8x8xf32>
    %cst_41 = arith.constant dense<0xFF800000> : vector<8xf32>
    %93 = vector.multi_reduction <maximumf>, %92, %cst_41 [1] : vector<8x8xf32> to vector<8xf32>
    %94 = vector.shape_cast %93 : vector<8xf32> to vector<8x1xf32>
    %95 = vector.broadcast %94 : vector<8x1xf32> to vector<8x8xf32>
    %96 = arith.subf %92, %95 : vector<8x8xf32>
    %97 = math.exp %96 : vector<8x8xf32>
    %cst_42 = arith.constant dense<0.000000e+00> : vector<8xf32>
    %98 = vector.multi_reduction <add>, %97, %cst_42 [1] : vector<8x8xf32> to vector<8xf32>
    %99 = vector.shape_cast %98 : vector<8xf32> to vector<8x1xf32>
    %100 = tpu.reciprocal %99 {approx = true} : vector<8x1xf32> -> vector<8x1xf32>
    %101 = vector.broadcast %100 : vector<8x1xf32> to vector<8x8xf32>
    %102 = arith.mulf %97, %101 : vector<8x8xf32>
    %103 = arith.truncf %102 : vector<8x8xf32> to vector<8x8xbf16>
    %cst_43 = arith.constant dense<0.000000e+00> : vector<8x4xf32>
    %104 = tpu.matmul %103, %89, %cst_43 {dimension_numbers = #tpu.dot_dimension_numbers<[1], [0], [0], [1], [0, 0, 1, 1], [], []>} : vector<8x8xbf16>, vector<8x4xbf16>, vector<8x4xf32> -> vector<8x4xf32>
    %105 = vector.extract_strided_slice %25 {offsets = [0, 16], sizes = [8, 4], strides = [1, 1]} : vector<8x32xbf16> to vector<8x4xbf16>
    %106 = vector.extract_strided_slice %26 {offsets = [0, 16], sizes = [8, 4], strides = [1, 1]} : vector<8x32xbf16> to vector<8x4xbf16>
    %107 = vector.extract_strided_slice %27 {offsets = [0, 16], sizes = [8, 4], strides = [1, 1]} : vector<8x32xbf16> to vector<8x4xbf16>
    %cst_44 = arith.constant dense<0.000000e+00> : vector<8x8xf32>
    %108 = tpu.matmul %105, %106, %cst_44 {dimension_numbers = #tpu.dot_dimension_numbers<[1], [1], [0], [0], [0, 0, 1, 0], [], []>} : vector<8x4xbf16>, vector<8x4xbf16>, vector<8x8xf32> -> vector<8x8xf32>
    %109 = vector.broadcast %32 : vector<1x8xf32> to vector<8x8xf32>
    %110 = arith.addf %108, %109 : vector<8x8xf32>
    %cst_45 = arith.constant dense<0xFF800000> : vector<8xf32>
    %111 = vector.multi_reduction <maximumf>, %110, %cst_45 [1] : vector<8x8xf32> to vector<8xf32>
    %112 = vector.shape_cast %111 : vector<8xf32> to vector<8x1xf32>
    %113 = vector.broadcast %112 : vector<8x1xf32> to vector<8x8xf32>
    %114 = arith.subf %110, %113 : vector<8x8xf32>
    %115 = math.exp %114 : vector<8x8xf32>
    %cst_46 = arith.constant dense<0.000000e+00> : vector<8xf32>
    %116 = vector.multi_reduction <add>, %115, %cst_46 [1] : vector<8x8xf32> to vector<8xf32>
    %117 = vector.shape_cast %116 : vector<8xf32> to vector<8x1xf32>
    %118 = tpu.reciprocal %117 {approx = true} : vector<8x1xf32> -> vector<8x1xf32>
    %119 = vector.broadcast %118 : vector<8x1xf32> to vector<8x8xf32>
    %120 = arith.mulf %115, %119 : vector<8x8xf32>
    %121 = arith.truncf %120 : vector<8x8xf32> to vector<8x8xbf16>
    %cst_47 = arith.constant dense<0.000000e+00> : vector<8x4xf32>
    %122 = tpu.matmul %121, %107, %cst_47 {dimension_numbers = #tpu.dot_dimension_numbers<[1], [0], [0], [1], [0, 0, 1, 1], [], []>} : vector<8x8xbf16>, vector<8x4xbf16>, vector<8x4xf32> -> vector<8x4xf32>
    %123 = vector.extract_strided_slice %25 {offsets = [0, 20], sizes = [8, 4], strides = [1, 1]} : vector<8x32xbf16> to vector<8x4xbf16>
    %124 = vector.extract_strided_slice %26 {offsets = [0, 20], sizes = [8, 4], strides = [1, 1]} : vector<8x32xbf16> to vector<8x4xbf16>
    %125 = vector.extract_strided_slice %27 {offsets = [0, 20], sizes = [8, 4], strides = [1, 1]} : vector<8x32xbf16> to vector<8x4xbf16>
    %cst_48 = arith.constant dense<0.000000e+00> : vector<8x8xf32>
    %126 = tpu.matmul %123, %124, %cst_48 {dimension_numbers = #tpu.dot_dimension_numbers<[1], [1], [0], [0], [0, 0, 1, 0], [], []>} : vector<8x4xbf16>, vector<8x4xbf16>, vector<8x8xf32> -> vector<8x8xf32>
    %127 = vector.broadcast %32 : vector<1x8xf32> to vector<8x8xf32>
    %128 = arith.addf %126, %127 : vector<8x8xf32>
    %cst_49 = arith.constant dense<0xFF800000> : vector<8xf32>
    %129 = vector.multi_reduction <maximumf>, %128, %cst_49 [1] : vector<8x8xf32> to vector<8xf32>
    %130 = vector.shape_cast %129 : vector<8xf32> to vector<8x1xf32>
    %131 = vector.broadcast %130 : vector<8x1xf32> to vector<8x8xf32>
    %132 = arith.subf %128, %131 : vector<8x8xf32>
    %133 = math.exp %132 : vector<8x8xf32>
    %cst_50 = arith.constant dense<0.000000e+00> : vector<8xf32>
    %134 = vector.multi_reduction <add>, %133, %cst_50 [1] : vector<8x8xf32> to vector<8xf32>
    %135 = vector.shape_cast %134 : vector<8xf32> to vector<8x1xf32>
    %136 = tpu.reciprocal %135 {approx = true} : vector<8x1xf32> -> vector<8x1xf32>
    %137 = vector.broadcast %136 : vector<8x1xf32> to vector<8x8xf32>
    %138 = arith.mulf %133, %137 : vector<8x8xf32>
    %139 = arith.truncf %138 : vector<8x8xf32> to vector<8x8xbf16>
    %cst_51 = arith.constant dense<0.000000e+00> : vector<8x4xf32>
    %140 = tpu.matmul %139, %125, %cst_51 {dimension_numbers = #tpu.dot_dimension_numbers<[1], [0], [0], [1], [0, 0, 1, 1], [], []>} : vector<8x8xbf16>, vector<8x4xbf16>, vector<8x4xf32> -> vector<8x4xf32>
    %141 = vector.extract_strided_slice %25 {offsets = [0, 24], sizes = [8, 4], strides = [1, 1]} : vector<8x32xbf16> to vector<8x4xbf16>
    %142 = vector.extract_strided_slice %26 {offsets = [0, 24], sizes = [8, 4], strides = [1, 1]} : vector<8x32xbf16> to vector<8x4xbf16>
    %143 = vector.extract_strided_slice %27 {offsets = [0, 24], sizes = [8, 4], strides = [1, 1]} : vector<8x32xbf16> to vector<8x4xbf16>
    %cst_52 = arith.constant dense<0.000000e+00> : vector<8x8xf32>
    %144 = tpu.matmul %141, %142, %cst_52 {dimension_numbers = #tpu.dot_dimension_numbers<[1], [1], [0], [0], [0, 0, 1, 0], [], []>} : vector<8x4xbf16>, vector<8x4xbf16>, vector<8x8xf32> -> vector<8x8xf32>
    %145 = vector.broadcast %32 : vector<1x8xf32> to vector<8x8xf32>
    %146 = arith.addf %144, %145 : vector<8x8xf32>
    %cst_53 = arith.constant dense<0xFF800000> : vector<8xf32>
    %147 = vector.multi_reduction <maximumf>, %146, %cst_53 [1] : vector<8x8xf32> to vector<8xf32>
    %148 = vector.shape_cast %147 : vector<8xf32> to vector<8x1xf32>
    %149 = vector.broadcast %148 : vector<8x1xf32> to vector<8x8xf32>
    %150 = arith.subf %146, %149 : vector<8x8xf32>
    %151 = math.exp %150 : vector<8x8xf32>
    %cst_54 = arith.constant dense<0.000000e+00> : vector<8xf32>
    %152 = vector.multi_reduction <add>, %151, %cst_54 [1] : vector<8x8xf32> to vector<8xf32>
    %153 = vector.shape_cast %152 : vector<8xf32> to vector<8x1xf32>
    %154 = tpu.reciprocal %153 {approx = true} : vector<8x1xf32> -> vector<8x1xf32>
    %155 = vector.broadcast %154 : vector<8x1xf32> to vector<8x8xf32>
    %156 = arith.mulf %151, %155 : vector<8x8xf32>
    %157 = arith.truncf %156 : vector<8x8xf32> to vector<8x8xbf16>
    %cst_55 = arith.constant dense<0.000000e+00> : vector<8x4xf32>
    %158 = tpu.matmul %157, %143, %cst_55 {dimension_numbers = #tpu.dot_dimension_numbers<[1], [0], [0], [1], [0, 0, 1, 1], [], []>} : vector<8x8xbf16>, vector<8x4xbf16>, vector<8x4xf32> -> vector<8x4xf32>
    %159 = vector.extract_strided_slice %25 {offsets = [0, 28], sizes = [8, 4], strides = [1, 1]} : vector<8x32xbf16> to vector<8x4xbf16>
    %160 = vector.extract_strided_slice %26 {offsets = [0, 28], sizes = [8, 4], strides = [1, 1]} : vector<8x32xbf16> to vector<8x4xbf16>
    %161 = vector.extract_strided_slice %27 {offsets = [0, 28], sizes = [8, 4], strides = [1, 1]} : vector<8x32xbf16> to vector<8x4xbf16>
    %cst_56 = arith.constant dense<0.000000e+00> : vector<8x8xf32>
    %162 = tpu.matmul %159, %160, %cst_56 {dimension_numbers = #tpu.dot_dimension_numbers<[1], [1], [0], [0], [0, 0, 1, 0], [], []>} : vector<8x4xbf16>, vector<8x4xbf16>, vector<8x8xf32> -> vector<8x8xf32>
    %163 = vector.broadcast %32 : vector<1x8xf32> to vector<8x8xf32>
    %164 = arith.addf %162, %163 : vector<8x8xf32>
    %cst_57 = arith.constant dense<0xFF800000> : vector<8xf32>
    %165 = vector.multi_reduction <maximumf>, %164, %cst_57 [1] : vector<8x8xf32> to vector<8xf32>
    %166 = vector.shape_cast %165 : vector<8xf32> to vector<8x1xf32>
    %167 = vector.broadcast %166 : vector<8x1xf32> to vector<8x8xf32>
    %168 = arith.subf %164, %167 : vector<8x8xf32>
    %169 = math.exp %168 : vector<8x8xf32>
    %cst_58 = arith.constant dense<0.000000e+00> : vector<8xf32>
    %170 = vector.multi_reduction <add>, %169, %cst_58 [1] : vector<8x8xf32> to vector<8xf32>
    %171 = vector.shape_cast %170 : vector<8xf32> to vector<8x1xf32>
    %172 = tpu.reciprocal %171 {approx = true} : vector<8x1xf32> -> vector<8x1xf32>
    %173 = vector.broadcast %172 : vector<8x1xf32> to vector<8x8xf32>
    %174 = arith.mulf %169, %173 : vector<8x8xf32>
    %175 = arith.truncf %174 : vector<8x8xf32> to vector<8x8xbf16>
    %cst_59 = arith.constant dense<0.000000e+00> : vector<8x4xf32>
    %176 = tpu.matmul %175, %161, %cst_59 {dimension_numbers = #tpu.dot_dimension_numbers<[1], [0], [0], [1], [0, 0, 1, 1], [], []>} : vector<8x8xbf16>, vector<8x4xbf16>, vector<8x4xf32> -> vector<8x4xf32>
    %177 = tpu.concatenate %50, %68, %86, %104, %122, %140, %158, %176 in 1 : vector<8x4xf32>, vector<8x4xf32>, vector<8x4xf32>, vector<8x4xf32>, vector<8x4xf32>, vector<8x4xf32>, vector<8x4xf32>, vector<8x4xf32> -> vector<8x32xf32>
    %178 = arith.truncf %177 : vector<8x32xf32> to vector<8x32xbf16>
    %c0_60 = arith.constant 0 : index
    %c0_61 = arith.constant 0 : index
    %179 = vector.load %arg11[%c0_60, %c0_61] : memref<32x32xbf16, #tpu.memory_space<vmem>>, vector<32x32xbf16>
    %cst_62 = arith.constant dense<0.000000e+00> : vector<8x32xf32>
    %180 = tpu.matmul %178, %179, %cst_62 {dimension_numbers = #tpu.dot_dimension_numbers<[1], [0], [0], [1], [0, 0, 1, 1], [], []>} : vector<8x32xbf16>, vector<32x32xbf16>, vector<8x32xf32> -> vector<8x32xf32>
    %c0_63 = arith.constant 0 : index
    %c0_64 = arith.constant 0 : index
    %181 = vector.load %arg12[%c0_63, %c0_64] : memref<1x32xf32, #tpu.memory_space<vmem>>, vector<1x32xf32>
    %182 = vector.broadcast %181 : vector<1x32xf32> to vector<8x32xf32>
    %183 = arith.addf %180, %182 : vector<8x32xf32>
    %184 = arith.truncf %183 : vector<8x32xf32> to vector<8x32xbf16>
    %c0_65 = arith.constant 0 : index
    %c0_66 = arith.constant 0 : index
    %185 = vector.load %arg13[%c0_65, %c0_66] : memref<32x32xbf16, #tpu.memory_space<vmem>>, vector<32x32xbf16>
    %cst_67 = arith.constant dense<0.000000e+00> : vector<8x32xf32>
    %186 = tpu.matmul %8, %185, %cst_67 {dimension_numbers = #tpu.dot_dimension_numbers<[1], [0], [0], [1], [0, 0, 1, 1], [], []>} : vector<8x32xbf16>, vector<32x32xbf16>, vector<8x32xf32> -> vector<8x32xf32>
    %c0_68 = arith.constant 0 : index
    %c0_69 = arith.constant 0 : index
    %187 = vector.load %arg14[%c0_68, %c0_69] : memref<32x32xbf16, #tpu.memory_space<vmem>>, vector<32x32xbf16>
    %cst_70 = arith.constant dense<0.000000e+00> : vector<8x32xf32>
    %188 = tpu.matmul %184, %187, %cst_70 {dimension_numbers = #tpu.dot_dimension_numbers<[1], [0], [0], [1], [0, 0, 1, 1], [], []>} : vector<8x32xbf16>, vector<32x32xbf16>, vector<8x32xf32> -> vector<8x32xf32>
    %189 = arith.addf %186, %188 : vector<8x32xf32>
    %c0_71 = arith.constant 0 : index
    %c0_72 = arith.constant 0 : index
    %190 = vector.load %arg15[%c0_71, %c0_72] : memref<1x32xf32, #tpu.memory_space<vmem>>, vector<1x32xf32>
    %191 = vector.broadcast %190 : vector<1x32xf32> to vector<8x32xf32>
    %192 = arith.addf %189, %191 : vector<8x32xf32>
    %193 = arith.negf %192 : vector<8x32xf32>
    %194 = math.exp %193 : vector<8x32xf32>
    %cst_73 = arith.constant 1.000000e+00 : f32
    %195 = vector.broadcast %cst_73 : f32 to vector<8x32xf32>
    %196 = arith.addf %195, %194 : vector<8x32xf32>
    %197 = arith.divf %195, %196 : vector<8x32xf32>
    %198 = arith.mulf %197, %183 : vector<8x32xf32>
    %199 = arith.addf %1, %198 : vector<8x32xf32>
    %cst_74 = arith.constant dense<0.000000e+00> : vector<8xf32>
    %200 = vector.multi_reduction <add>, %199, %cst_74 [1] : vector<8x32xf32> to vector<8xf32>
    %201 = vector.shape_cast %200 : vector<8xf32> to vector<8x1xf32>
    %cst_75 = arith.constant 3.200000e+01 : f32
    %202 = vector.broadcast %cst_75 : f32 to vector<8x1xf32>
    %203 = arith.divf %201, %202 : vector<8x1xf32>
    %204 = vector.broadcast %203 : vector<8x1xf32> to vector<8x32xf32>
    %205 = arith.subf %199, %204 : vector<8x32xf32>
    %206 = arith.mulf %205, %205 : vector<8x32xf32>
    %cst_76 = arith.constant dense<0.000000e+00> : vector<8xf32>
    %207 = vector.multi_reduction <add>, %206, %cst_76 [1] : vector<8x32xf32> to vector<8xf32>
    %208 = vector.shape_cast %207 : vector<8xf32> to vector<8x1xf32>
    %cst_77 = arith.constant 3.200000e+01 : f32
    %209 = vector.broadcast %cst_77 : f32 to vector<8x1xf32>
    %210 = arith.divf %208, %209 : vector<8x1xf32>
    %211 = vector.broadcast %203 : vector<8x1xf32> to vector<8x32xf32>
    %212 = arith.subf %199, %211 : vector<8x32xf32>
    %cst_78 = arith.constant 9.99999974E-6 : f32
    %213 = vector.broadcast %cst_78 : f32 to vector<8x1xf32>
    %214 = arith.addf %210, %213 : vector<8x1xf32>
    %215 = math.rsqrt %214 : vector<8x1xf32>
    %216 = vector.broadcast %215 : vector<8x1xf32> to vector<8x32xf32>
    %217 = arith.mulf %212, %216 : vector<8x32xf32>
    %c0_79 = arith.constant 0 : index
    %c0_80 = arith.constant 0 : index
    %218 = vector.load %arg16[%c0_79, %c0_80] : memref<1x32xf32, #tpu.memory_space<vmem>>, vector<1x32xf32>
    %219 = vector.broadcast %218 : vector<1x32xf32> to vector<8x32xf32>
    %220 = arith.mulf %217, %219 : vector<8x32xf32>
    %c0_81 = arith.constant 0 : index
    %c0_82 = arith.constant 0 : index
    %221 = vector.load %arg17[%c0_81, %c0_82] : memref<1x32xf32, #tpu.memory_space<vmem>>, vector<1x32xf32>
    %222 = vector.broadcast %221 : vector<1x32xf32> to vector<8x32xf32>
    %223 = arith.addf %220, %222 : vector<8x32xf32>
    %224 = arith.truncf %223 : vector<8x32xf32> to vector<8x32xbf16>
    %c0_83 = arith.constant 0 : index
    %c0_84 = arith.constant 0 : index
    %225 = vector.load %arg18[%c0_83, %c0_84] : memref<32x16xbf16, #tpu.memory_space<vmem>>, vector<32x16xbf16>
    %cst_85 = arith.constant dense<0.000000e+00> : vector<8x16xf32>
    %226 = tpu.matmul %224, %225, %cst_85 {dimension_numbers = #tpu.dot_dimension_numbers<[1], [0], [0], [1], [0, 0, 1, 1], [], []>} : vector<8x32xbf16>, vector<32x16xbf16>, vector<8x16xf32> -> vector<8x16xf32>
    %c0_86 = arith.constant 0 : index
    %c0_87 = arith.constant 0 : index
    %227 = vector.load %arg19[%c0_86, %c0_87] : memref<1x16xf32, #tpu.memory_space<vmem>>, vector<1x16xf32>
    %228 = vector.broadcast %227 : vector<1x16xf32> to vector<8x16xf32>
    %229 = arith.addf %226, %228 : vector<8x16xf32>
    %230 = math.tanh %229 : vector<8x16xf32>
    %c0_88 = arith.constant 0 : index
    %c0_89 = arith.constant 0 : index
    %231 = vector.load %arg20[%c0_88, %c0_89] : memref<1x16xf32, #tpu.memory_space<vmem>>, vector<1x16xf32>
    %232 = vector.broadcast %231 : vector<1x16xf32> to vector<8x16xf32>
    %233 = arith.mulf %230, %232 : vector<8x16xf32>
    %cst_90 = arith.constant dense<0.000000e+00> : vector<8xf32>
    %234 = vector.multi_reduction <add>, %233, %cst_90 [1] : vector<8x16xf32> to vector<8xf32>
    %235 = vector.shape_cast %234 : vector<8xf32> to vector<8x1xf32>
    %c0_91 = arith.constant 0 : index
    %c0_92 = arith.constant 0 : index
    %236 = vector.load %arg21[%c0_91, %c0_92] : memref<1x1xf32, #tpu.memory_space<vmem>>, vector<1x1xf32>
    %237 = vector.broadcast %236 : vector<1x1xf32> to vector<8x1xf32>
    %238 = arith.addf %235, %237 : vector<8x1xf32>
    %cst_93 = arith.constant 0.000000e+00 : f32
    %239 = vector.broadcast %cst_93 : f32 to vector<8x1xf32>
    %240 = arith.cmpf oeq, %5, %239 : vector<8x1xf32>
    %cst_94 = arith.constant -1.000000e+09 : f32
    %241 = vector.broadcast %cst_94 : f32 to vector<8x1xf32>
    %242 = arith.select %240, %241, %238 : vector<8x1xi1>, vector<8x1xf32>
    %cst_95 = arith.constant dense<0xFF800000> : vector<1xf32>
    %243 = vector.multi_reduction <maximumf>, %242, %cst_95 [0] : vector<8x1xf32> to vector<1xf32>
    %244 = vector.shape_cast %243 : vector<1xf32> to vector<1x1xf32>
    %245 = vector.broadcast %244 : vector<1x1xf32> to vector<8x1xf32>
    %246 = arith.subf %242, %245 : vector<8x1xf32>
    %247 = math.exp %246 : vector<8x1xf32>
    %cst_96 = arith.constant dense<0.000000e+00> : vector<1xf32>
    %248 = vector.multi_reduction <add>, %247, %cst_96 [0] : vector<8x1xf32> to vector<1xf32>
    %249 = vector.shape_cast %248 : vector<1xf32> to vector<1x1xf32>
    %250 = tpu.reciprocal %249 {approx = true} : vector<1x1xf32> -> vector<1x1xf32>
    %251 = vector.broadcast %250 : vector<1x1xf32> to vector<8x1xf32>
    %252 = arith.mulf %247, %251 : vector<8x1xf32>
    %253 = vector.broadcast %252 : vector<8x1xf32> to vector<8x32xf32>
    %254 = arith.mulf %223, %253 : vector<8x32xf32>
    %cst_97 = arith.constant dense<0.000000e+00> : vector<32xf32>
    %255 = vector.multi_reduction <add>, %254, %cst_97 [0] : vector<8x32xf32> to vector<32xf32>
    %256 = vector.shape_cast %255 : vector<32xf32> to vector<1x32xf32>
    %257 = arith.truncf %256 : vector<1x32xf32> to vector<1x32xbf16>
    %c0_98 = arith.constant 0 : index
    %c0_99 = arith.constant 0 : index
    %258 = vector.load %arg22[%c0_98, %c0_99] : memref<32x128xbf16, #tpu.memory_space<vmem>>, vector<32x128xbf16>
    %cst_100 = arith.constant dense<0.000000e+00> : vector<1x128xf32>
    %259 = tpu.matmul %257, %258, %cst_100 {dimension_numbers = #tpu.dot_dimension_numbers<[1], [0], [0], [1], [0, 0, 1, 1], [], []>} : vector<1x32xbf16>, vector<32x128xbf16>, vector<1x128xf32> -> vector<1x128xf32>
    %c0_101 = arith.constant 0 : index
    %c0_102 = arith.constant 0 : index
    %260 = vector.load %arg23[%c0_101, %c0_102] : memref<1x128xf32, #tpu.memory_space<vmem>>, vector<1x128xf32>
    %261 = arith.addf %259, %260 : vector<1x128xf32>
    %cst_103 = arith.constant 0.000000e+00 : f32
    %262 = vector.broadcast %cst_103 : f32 to vector<1x128xf32>
    %263 = arith.maximumf %261, %262 : vector<1x128xf32>
    %264 = arith.truncf %263 : vector<1x128xf32> to vector<1x128xbf16>
    %c0_104 = arith.constant 0 : index
    %c0_105 = arith.constant 0 : index
    %265 = vector.load %arg24[%c0_104, %c0_105] : memref<128x128xbf16, #tpu.memory_space<vmem>>, vector<128x128xbf16>
    %cst_106 = arith.constant dense<0.000000e+00> : vector<1x128xf32>
    %266 = tpu.matmul %264, %265, %cst_106 {dimension_numbers = #tpu.dot_dimension_numbers<[1], [0], [0], [1], [0, 0, 1, 1], [], []>} : vector<1x128xbf16>, vector<128x128xbf16>, vector<1x128xf32> -> vector<1x128xf32>
    %c0_107 = arith.constant 0 : index
    %c0_108 = arith.constant 0 : index
    %267 = vector.load %arg25[%c0_107, %c0_108] : memref<1x128xf32, #tpu.memory_space<vmem>>, vector<1x128xf32>
    %268 = arith.addf %266, %267 : vector<1x128xf32>
    %cst_109 = arith.constant 0.000000e+00 : f32
    %269 = vector.broadcast %cst_109 : f32 to vector<1x128xf32>
    %270 = arith.maximumf %268, %269 : vector<1x128xf32>
    %271 = arith.truncf %270 : vector<1x128xf32> to vector<1x128xbf16>
    %c0_110 = arith.constant 0 : index
    %c0_111 = arith.constant 0 : index
    %272 = vector.load %arg26[%c0_110, %c0_111] : memref<128x128xbf16, #tpu.memory_space<vmem>>, vector<128x128xbf16>
    %cst_112 = arith.constant dense<0.000000e+00> : vector<1x128xf32>
    %273 = tpu.matmul %271, %272, %cst_112 {dimension_numbers = #tpu.dot_dimension_numbers<[1], [0], [0], [1], [0, 0, 1, 1], [], []>} : vector<1x128xbf16>, vector<128x128xbf16>, vector<1x128xf32> -> vector<1x128xf32>
    %c0_113 = arith.constant 0 : index
    %c0_114 = arith.constant 0 : index
    %274 = vector.load %arg27[%c0_113, %c0_114] : memref<1x128xf32, #tpu.memory_space<vmem>>, vector<1x128xf32>
    %275 = arith.addf %273, %274 : vector<1x128xf32>
    %c0_115 = arith.constant 0 : index
    %c0_116 = arith.constant 0 : index
    %c0_117 = arith.constant 0 : index
    %276 = vector.load %arg28[%c0_115, %c0_116, %c0_117] : memref<1x1x128xf32, #tpu.memory_space<vmem>>, vector<1x1x128xf32>
    %277 = vector.shape_cast %276 : vector<1x1x128xf32> to vector<1x128xf32>
    %278 = vector.shape_cast %275 : vector<1x128xf32> to vector<1x1x128xf32>
    tpu.vector_store %arg28[%c0_115, %c0_116, %c0_117], %278 {strides = array<i32>} : memref<1x1x128xf32, #tpu.memory_space<vmem>>, vector<1x1x128xf32>,
    return
  }
  func.func @transform_0(%arg0: i32) -> (i32, i32, i32) {
    %c0_i32 = arith.constant 0 : i32
    %c0_i32_0 = arith.constant 0 : i32
    %c0_i32_1 = arith.constant 0 : i32
    return %arg0, %c0_i32, %c0_i32_0 : i32, i32, i32
  }
  func.func @transform_1(%arg0: i32) -> (i32, i32, i32) {
    %c0_i32 = arith.constant 0 : i32
    %c0_i32_0 = arith.constant 0 : i32
    %c0_i32_1 = arith.constant 0 : i32
    return %arg0, %c0_i32, %c0_i32_0 : i32, i32, i32
  }
  func.func @transform_2(%arg0: i32) -> (i32, i32, i32) {
    %c0_i32 = arith.constant 0 : i32
    %c0_i32_0 = arith.constant 0 : i32
    %c0_i32_1 = arith.constant 0 : i32
    return %arg0, %c0_i32, %c0_i32_0 : i32, i32, i32
  }
  func.func @transform_3(%arg0: i32) -> (i32, i32, i32) {
    %c0_i32 = arith.constant 0 : i32
    %c0_i32_0 = arith.constant 0 : i32
    %c0_i32_1 = arith.constant 0 : i32
    return %arg0, %c0_i32, %c0_i32_0 : i32, i32, i32
  }
  func.func @transform_4(%arg0: i32) -> (i32, i32) {
    %c0_i32 = arith.constant 0 : i32
    %c0_i32_0 = arith.constant 0 : i32
    %c0_i32_1 = arith.constant 0 : i32
    return %c0_i32, %c0_i32_0 : i32, i32
  }
  func.func @transform_5(%arg0: i32) -> (i32, i32) {
    %c0_i32 = arith.constant 0 : i32
    %c0_i32_0 = arith.constant 0 : i32
    %c0_i32_1 = arith.constant 0 : i32
    return %c0_i32, %c0_i32_0 : i32, i32
  }
  func.func @transform_6(%arg0: i32) -> (i32, i32) {
    %c0_i32 = arith.constant 0 : i32
    %c0_i32_0 = arith.constant 0 : i32
    %c0_i32_1 = arith.constant 0 : i32
    return %c0_i32, %c0_i32_0 : i32, i32
  }
  func.func @transform_7(%arg0: i32) -> (i32, i32) {
    %c0_i32 = arith.constant 0 : i32
    %c0_i32_0 = arith.constant 0 : i32
    %c0_i32_1 = arith.constant 0 : i32
    return %c0_i32, %c0_i32_0 : i32, i32
  }
  func.func @transform_8(%arg0: i32) -> (i32, i32) {
    %c0_i32 = arith.constant 0 : i32
    %c0_i32_0 = arith.constant 0 : i32
    %c0_i32_1 = arith.constant 0 : i32
    return %c0_i32, %c0_i32_0 : i32, i32
  }
  func.func @transform_9(%arg0: i32) -> (i32, i32) {
    %c0_i32 = arith.constant 0 : i32
    %c0_i32_0 = arith.constant 0 : i32
    %c0_i32_1 = arith.constant 0 : i32
    return %c0_i32, %c0_i32_0 : i32, i32
  }
  func.func @transform_10(%arg0: i32) -> (i32, i32) {
    %c0_i32 = arith.constant 0 : i32
    %c0_i32_0 = arith.constant 0 : i32
    %c0_i32_1 = arith.constant 0 : i32
    return %c0_i32, %c0_i32_0 : i32, i32
  }
  func.func @transform_11(%arg0: i32) -> (i32, i32) {
    %c0_i32 = arith.constant 0 : i32
    %c0_i32_0 = arith.constant 0 : i32
    %c0_i32_1 = arith.constant 0 : i32
    return %c0_i32, %c0_i32_0 : i32, i32
  }
  func.func @transform_12(%arg0: i32) -> (i32, i32) {
    %c0_i32 = arith.constant 0 : i32
    %c0_i32_0 = arith.constant 0 : i32
    %c0_i32_1 = arith.constant 0 : i32
    return %c0_i32, %c0_i32_0 : i32, i32
  }
  func.func @transform_13(%arg0: i32) -> (i32, i32) {
    %c0_i32 = arith.constant 0 : i32
    %c0_i32_0 = arith.constant 0 : i32
    %c0_i32_1 = arith.constant 0 : i32
    return %c0_i32, %c0_i32_0 : i32, i32
  }
  func.func @transform_14(%arg0: i32) -> (i32, i32) {
    %c0_i32 = arith.constant 0 : i32
    %c0_i32_0 = arith.constant 0 : i32
    %c0_i32_1 = arith.constant 0 : i32
    return %c0_i32, %c0_i32_0 : i32, i32
  }
  func.func @transform_15(%arg0: i32) -> (i32, i32) {
    %c0_i32 = arith.constant 0 : i32
    %c0_i32_0 = arith.constant 0 : i32
    %c0_i32_1 = arith.constant 0 : i32
    return %c0_i32, %c0_i32_0 : i32, i32
  }
  func.func @transform_16(%arg0: i32) -> (i32, i32) {
    %c0_i32 = arith.constant 0 : i32
    %c0_i32_0 = arith.constant 0 : i32
    %c0_i32_1 = arith.constant 0 : i32
    return %c0_i32, %c0_i32_0 : i32, i32
  }
  func.func @transform_17(%arg0: i32) -> (i32, i32) {
    %c0_i32 = arith.constant 0 : i32
    %c0_i32_0 = arith.constant 0 : i32
    %c0_i32_1 = arith.constant 0 : i32
    return %c0_i32, %c0_i32_0 : i32, i32
  }
  func.func @transform_18(%arg0: i32) -> (i32, i32) {
    %c0_i32 = arith.constant 0 : i32
    %c0_i32_0 = arith.constant 0 : i32
    %c0_i32_1 = arith.constant 0 : i32
    return %c0_i32, %c0_i32_0 : i32, i32
  }
  func.func @transform_19(%arg0: i32) -> (i32, i32) {
    %c0_i32 = arith.constant 0 : i32
    %c0_i32_0 = arith.constant 0 : i32
    %c0_i32_1 = arith.constant 0 : i32
    return %c0_i32, %c0_i32_0 : i32, i32
  }
  func.func @transform_20(%arg0: i32) -> (i32, i32) {
    %c0_i32 = arith.constant 0 : i32
    %c0_i32_0 = arith.constant 0 : i32
    %c0_i32_1 = arith.constant 0 : i32
    return %c0_i32, %c0_i32_0 : i32, i32
  }
  func.func @transform_21(%arg0: i32) -> (i32, i32) {
    %c0_i32 = arith.constant 0 : i32
    %c0_i32_0 = arith.constant 0 : i32
    %c0_i32_1 = arith.constant 0 : i32
    return %c0_i32, %c0_i32_0 : i32, i32
  }
  func.func @transform_22(%arg0: i32) -> (i32, i32) {
    %c0_i32 = arith.constant 0 : i32
    %c0_i32_0 = arith.constant 0 : i32
    %c0_i32_1 = arith.constant 0 : i32
    return %c0_i32, %c0_i32_0 : i32, i32
  }
  func.func @transform_23(%arg0: i32) -> (i32, i32) {
    %c0_i32 = arith.constant 0 : i32
    %c0_i32_0 = arith.constant 0 : i32
    %c0_i32_1 = arith.constant 0 : i32
    return %c0_i32, %c0_i32_0 : i32, i32
  }
  func.func @transform_24(%arg0: i32) -> (i32, i32) {
    %c0_i32 = arith.constant 0 : i32
    %c0_i32_0 = arith.constant 0 : i32
    %c0_i32_1 = arith.constant 0 : i32
    return %c0_i32, %c0_i32_0 : i32, i32
  }
  func.func @transform_25(%arg0: i32) -> (i32, i32) {
    %c0_i32 = arith.constant 0 : i32
    %c0_i32_0 = arith.constant 0 : i32
    %c0_i32_1 = arith.constant 0 : i32
    return %c0_i32, %c0_i32_0 : i32, i32
  }
  func.func @transform_26(%arg0: i32) -> (i32, i32) {
    %c0_i32 = arith.constant 0 : i32
    %c0_i32_0 = arith.constant 0 : i32
    %c0_i32_1 = arith.constant 0 : i32
    return %c0_i32, %c0_i32_0 : i32, i32
  }
  func.func @transform_27(%arg0: i32) -> (i32, i32, i32) {
    %c0_i32 = arith.constant 0 : i32
    %c0_i32_0 = arith.constant 0 : i32
    %c0_i32_1 = arith.constant 0 : i32
    return %arg0, %c0_i32, %c0_i32_0 : i32, i32, i32
  }
}

</mosaic_0001>

<bundles_post_ra>
// kernel: tpu_custom_call.1
= control target key start
LH: loop header
LB: loop body
LE: loop exit
PB: predicated region body
PF: predicated region fallthrough
CT: control target
= control target key end

     0   :  { %s5636_s0 = inlined_call_operand.hbm [shape: f32[2,8,32], index: 0, kind: input, shape index: {}]   ;;  %s5637_s1 = inlined_call_operand.hbm [shape: f32[2,8,32], index: 1, kind: input, shape index: {}]   ;;  %s5638_s2 = inlined_call_operand.vmem [shape: f32[2,8,1], index: 2, kind: input, shape index: {}]   ;;  %s5639_s3 = inlined_call_operand.hbm [shape: f32[2,1,8], index: 3, kind: input, shape index: {}]   ;;  %s5640_s4 = inlined_call_operand.hbm [shape: bf16[32,32], index: 4, kind: input, shape index: {}]   ;;  %s5641_s5 = inlined_call_operand.vmem [shape: f32[1,32], index: 5, kind: input, shape index: {}]   ;;  %s5642_s6 = inlined_call_operand.hbm [shape: bf16[32,32], index: 6, kind: input, shape index: {}]   ;;  %s5643_s7 = inlined_call_operand.hbm [shape: f32[1,32], index: 7, kind: input, shape index: {}]   ;;  %s5644_s8 = inlined_call_operand.hbm [shape: bf16[32,32], index: 8, kind: input, shape index: {}]   ;;  %s5645_s9 = inlined_call_operand.hbm [shape: f32[1,32], index: 9, kind: input, shape index: {}]   ;;  %s5646_s10 = inlined_call_operand.hbm [shape: bf16[32,32], index: 10, kind: input, shape index: {}]   ;;  %s5647_s11 = inlined_call_operand.hbm [shape: f32[1,32], index: 11, kind: input, shape index: {}]   ;;  %s5648_s12 = inlined_call_operand.hbm [shape: bf16[32,32], index: 12, kind: input, shape index: {}]   ;;  %s5649_s13 = inlined_call_operand.hbm [shape: bf16[32,32], index: 13, kind: input, shape index: {}]   ;;  %s5650_s14 = inlined_call_operand.hbm [shape: f32[1,32], index: 14, kind: input, shape index: {}]   ;;  %s5651_s15 = inlined_call_operand.hbm [shape: f32[1,32], index: 15, kind: input, shape index: {}]   ;;  %s5652_s16 = inlined_call_operand.hbm [shape: f32[1,32], index: 16, kind: input, shape index: {}]   ;;  %s5653_s17 = inlined_call_operand.vmem [shape: bf16[32,16], index: 17, kind: input, shape index: {}]   ;;  %s5654_s18 = inlined_call_operand.hbm [shape: f32[1,16], index: 18, kind: input, shape index: {}]   ;;  %s5655_s19 = inlined_call_operand.hbm [shape: f32[1,16], index: 19, kind: input, shape index: {}]   ;;  %s5656_s20 = inlined_call_operand.<no memory space> [shape: f32[1,1], index: 20, kind: input, shape index: {}]   ;;  %s5657_s21 = inlined_call_operand.hbm [shape: bf16[32,128], index: 21, kind: input, shape index: {}]   ;;  %s5658_s22 = inlined_call_operand.hbm [shape: f32[1,128], index: 22, kind: input, shape index: {}]   ;;  %s5659_s23 = inlined_call_operand.vmem [shape: bf16[128,128], index: 23, kind: input, shape index: {}]   ;;  %s5660_s24 = inlined_call_operand.vmem [shape: f32[1,128], index: 24, kind: input, shape index: {}]   ;;  %s5661_s25 = inlined_call_operand.vmem [shape: bf16[128,128], index: 25, kind: input, shape index: {}]   ;;  %s5662_s26 = inlined_call_operand.vmem [shape: f32[1,128], index: 26, kind: input, shape index: {}]   ;;  %s5663_s27 = inlined_call_operand.hbm [shape: f32[2,1,128], index: 27, kind: output, shape index: {}]  }
   0x1   :  { %5712 = sst [smem:[#allocation52_spill]] %s5636_s0  ;;  %v32_v0 = vstv %s5656_s20 }
   0x2   :  { %5713 = sst [smem:[#allocation53_spill]] %s5637_s1  ;;  %33 = vst [vmem:[#allocation2] sm:$0x1] %v32_v0 }
   0x3   :  { %5714 = sst [smem:[#allocation54_spill]] %s5638_s2 }
   0x4   :  { %5715 = sst [smem:[#allocation55_spill]] %s5639_s3 }
   0x5   :  { %5716 = sst [smem:[#allocation56_spill]] %s5640_s4 }
   0x6   :  { %5717 = sst [smem:[#allocation57_spill]] %s5641_s5 }
   0x7   :  { %5718 = sst [smem:[#allocation58_spill]] %s5642_s6 }
   0x8   :  { %5719 = sst [smem:[#allocation59_spill]] %s5643_s7 }
   0x9   :  { %5720 = sst [smem:[#allocation60_spill]] %s5644_s8 }
   0xa   :  { %5721 = sst [smem:[#allocation61_spill]] %s5645_s9 }
   0xb   :  { %5722 = sst [smem:[#allocation62_spill]] %s5646_s10 }
   0xc   :  { %5723 = sst [smem:[#allocation63_spill]] %s5647_s11 }
   0xd   :  { %5724 = sst [smem:[#allocation64_spill]] %s5649_s13 }
   0xe   :  { %5725 = sst [smem:[#allocation65_spill]] %s5651_s15 }
   0xf   :  { %5726 = sst [smem:[#allocation66_spill]] %s5653_s17 }
  0x10   :  { %5727 = sst [smem:[#allocation67_spill]] %s5654_s18 }
  0x11   :  { %5728 = sst [smem:[#allocation68_spill]] %s5657_s21 }
  0x12   :  { %5729 = sst [smem:[#allocation69_spill]] %s5658_s22 }
  0x13   :  { %5730 = sst [smem:[#allocation70_spill]] %s5659_s23 }
  0x14   :  { %5731 = sst [smem:[#allocation71_spill]] %s5660_s24 }
  0x15   :  { %5732 = sst [smem:[#allocation72_spill]] %s5661_s25 }
  0x16   :  { %5733 = sst [smem:[#allocation73_spill]] %s5662_s26 }
  0x17   :  { %5734 = sst [smem:[#allocation74_spill]] %s5663_s27 }
  0x18   :  { %34 = vsyncpa [#allocation4], 0 }
  0x19   :  { %36 = vsyncpa [#allocation4 + $0x1], 0 }
  0x1a   :  { %37 = vsyncpa [#allocation7], 0 }
  0x1b   :  { %39 = vsyncpa [#allocation7 + $0x1], 0 }
  0x1c   :  { %40 = vsyncpa [#allocation10], 0 }
  0x1d   :  { %41 = vsyncpa [#allocation13], 0 }
  0x1e   :  { %42 = vsyncpa [#allocation16], 0 }
  0x1f   :  { %43 = vsyncpa [#allocation19], 0 }
  0x20   :  { %44 = vsyncpa [#allocation22], 0 }
  0x21   :  { %45 = vsyncpa [#allocation25], 0 }
  0x22   :  { %46 = vsyncpa [#allocation28], 0 }
  0x23   :  { %47 = vsyncpa [#allocation31], 0 }
  0x24   :  { %48 = vsyncpa [#allocation5], 0 }
  0x25   :  { %50 = vsyncpa [#allocation5 + $0x1], 0  ;;  %s4705_s8 = smov 0   ;;  %s4707_s30 = smov 0  }
  0x26   :  { %s4709_s20 = smov 0   ;;  %s4711_s9 = smov 0  }
  0x27 LB: > { %5735 = sst [smem:[#allocation45_spill]] %s4508_s8  ;;  %s4522_s5 = smov [#allocation9]   ;;  %s4520_s9 = sphi %s4711_s9, %s5808_s9   ;;  %s4516_s20 = sphi %s4709_s20, %s5810_s20   ;;  %s4512_s30 = sphi %s4707_s30, %s5812_s30   ;;  %s4508_s8 = sphi %s4705_s8, %s5811_s8  }
  0x28   : > { %5736 = sst [smem:[#allocation46_spill]] %s4516_s20  ;;  %s686_s28 = sshll.u32 %s4522_s5, 4  ;;  %s4731_s28 = int_to_ptr.vmem [resolvable:$true] %s686_s28 }
  0x29   : > { %s4726_s0 = sadd.s32 4294967295, %s4520_s9   ;;  %p3179_p0 = scmp.ge.s32.totalorder %s4520_s9, 1 }
  0x2a   : > { %p5685_p1 = scmp.eq.s32.totalorder %s4726_s0, 0  ;;  %p674_p2 = scmp.lt.s32.totalorder %s4520_s9, 3 }
  0x2b   : > { %s4523_s29 = smov [#allocation12]   ;;  %s4524_s11 = smov [#allocation15]  }
  0x2c   : > { %p4733_p3 = pnand %p3179_p0, %p674_p2  ;;  %s716_s1 = sshll.u32 %s4523_s29, 4  ;;  %s4746_s1 = int_to_ptr.vmem [resolvable:$true] %s716_s1 }
  0x2d   : > { %s740_s2 = sshll.u32 %s4524_s11, 4  ;;  %s5740_s4 = sld [smem:[#allocation56_spill]]  ;;  %s4748_s2 = int_to_ptr.vmem [resolvable:$true] %s740_s2 }
  0x2e   : > { %s5737_s10 = scalar_select %p4733_p3, 1, 0 }
  0x2f   : > { %p3638_p5 = pneg %p4733_p3 }
  0x30   : > { %5738 = sst [smem:[#allocation47_spill]] %s5737_s10 }
  0x31   : > { %p4742_p6 = pnand %p3638_p5, %p5685_p1 }
  0x33   : > { %s5739_s6 = scalar_select %p4742_p6, 1, 0 }
  0x34   : > { %s3880_s5 = scalar_lea.hbm %s5740_s4, 256  ;;  %p4758_p8 = pneg %p4742_p6 }
  0x35   : > { %p3881_p7 = scmp.ne.s32.totalorder %s5740_s4, %s3880_s5  ;;  %p3887_p11 = scmp.lt.u32.totalorder %s3880_s5, %s5740_s4 }
  0x36   : > { %s5741_s29 = scalar_select %p4758_p8, 1, 0 }
  0x37   : > { %p3883_p9 = pnand %p4758_p8, %p3881_p7 }
  0x39   : > { %p3884_p10 = pneg %p3883_p9 }
  0x3b   : > { %p3889_p12 = pnand %p3887_p11, %p3884_p10 }
  0x3d   : > { %3892 = shalt.err (!%p3889_p12)
}
  0x3e   : > { %s3893_s26 = scalar_lea.vmem %s4731_s28, 256  ;;  %p3901_p5 = scmp.lt.s32.totalorder %s4731_s28, %s4731_s28 }
  0x3f   : > { %p3894_p13 = scmp.ne.s32.totalorder %s4731_s28, %s3893_s26  ;;  %p3902_p4 = scmp.lt.s32.totalorder %s3893_s26, %s3893_s26 }
  0x41   : > { %p3896_p0 = pnand %p3894_p13, %p4758_p8  ;;  %p3903_p7 = por %p3902_p4, %p3901_p5 }
  0x43   : > { %p3897_p2 = pneg %p3896_p0 }
  0x45   : > { %p3904_p9 = pnand %p3903_p7, %p3897_p2 }
  0x47   : > { %3907 = shalt.err (!%p3904_p9)
}
  0x48   : > { %s5680_s27 = smov 64   ;;  %s5682_s24 = smov 4  }
  0x49   : > { %3641 = dma.hbm_to_vmem [thread:$0]  (!%p4742_p6), %s5740_s4, 256, %s4731_s28, [#allocation10], %s5680_s27, %s5680_s27, %s5682_s24  }
  0x4a   : > { %s5742_s25 = sld [smem:[#allocation59_spill]] }
  0x50   : > { %s3908_s26 = scalar_lea.hbm %s5742_s25, 16 }
  0x51   : > { %p3909_p4 = scmp.ne.s32.totalorder %s5742_s25, %s3908_s26  ;;  %p3915_p12 = scmp.lt.u32.totalorder %s3908_s26, %s5742_s25 }
  0x53   : > { %p3911_p10 = pnand %p3909_p4, %p4758_p8 }
  0x55   : > { %p3912_p11 = pneg %p3911_p10 }
  0x57   : > { %p3917_p13 = pnand %p3915_p12, %p3912_p11 }
  0x59   : > { %3920 = shalt.err (!%p3917_p13)
}
  0x5a   : > { %s3921_s28 = scalar_lea.vmem %s4746_s1, 16  ;;  %s3928_s17 = scalar_lea.vmem %s4746_s1, 32 }
  0x5b   : > { %p3922_p0 = scmp.ne.s32.totalorder %s4746_s1, %s3921_s28  ;;  %p3929_p7 = scmp.lt.s32.totalorder %s4746_s1, %s4746_s1 }
  0x5c   : > { %p3930_p9 = scmp.lt.s32.totalorder %s3928_s17, %s3921_s28 }
  0x5d   : > { %p3924_p2 = pnand %p3922_p0, %p4758_p8 }
  0x5e   : > { %p3931_p4 = por %p3930_p9, %p3929_p7 }
  0x5f   : > { %p3925_p5 = pneg %p3924_p2 }
  0x61   : > { %p3932_p10 = pnand %p3931_p4, %p3925_p5 }
  0x63   : > { %3935 = shalt.err (!%p3932_p10)
}
  0x64   : > { %3647 = dma.hbm_to_vmem [thread:$0]  (!%p4742_p6), %s5742_s25, 16, %s4746_s1, [#allocation13]  }
  0x65   : > { %s5743_s7 = sld [smem:[#allocation61_spill]] }
  0x6b   : > { %s3936_s5 = scalar_lea.hbm %s5743_s7, 16 }
  0x6c   : > { %p3937_p11 = scmp.ne.s32.totalorder %s5743_s7, %s3936_s5  ;;  %p3943_p0 = scmp.lt.u32.totalorder %s3936_s5, %s5743_s7 }
  0x6e   : > { %p3939_p12 = pnand %p3937_p11, %p4758_p8 }
  0x70   : > { %p3940_p13 = pneg %p3939_p12 }
  0x72   : > { %p3945_p2 = pnand %p3943_p0, %p3940_p13 }
  0x74   : > { %3948 = shalt.err (!%p3945_p2)
}
  0x75   : > { %s3949_s1 = scalar_lea.vmem %s4748_s2, 16  ;;  %s3956_s22 = scalar_lea.vmem %s4748_s2, 32 }
  0x76   : > { %p3950_p5 = scmp.ne.s32.totalorder %s4748_s2, %s3949_s1  ;;  %p3957_p4 = scmp.lt.s32.totalorder %s4748_s2, %s4748_s2 }
  0x77   : > { %p3958_p10 = scmp.lt.s32.totalorder %s3956_s22, %s3949_s1 }
  0x78   : > { %p3952_p7 = pnand %p3950_p5, %p4758_p8 }
  0x79   : > { %p3959_p11 = por %p3958_p10, %p3957_p4 }
  0x7a   : > { %p3953_p9 = pneg %p3952_p7 }
  0x7c   : > { %p3960_p12 = pnand %p3959_p11, %p3953_p9 }
  0x7e   : > { %3963 = shalt.err (!%p3960_p12)
}
  0x7f   : > { %3653 = dma.hbm_to_vmem [thread:$0]  (!%p4742_p6), %s5743_s7, 16, %s4748_s2, [#allocation16]  }
  0x80   : > { %s4527_s3 = smov [#allocation18]   ;;  %s4528_s11 = smov [#allocation21]  }
  0x81   : > { %s764_s5 = sshll.u32 %s4527_s3, 4  ;;  %s787_s26 = sshll.u32 %s4528_s11, 4  ;;  %s765_s5 = int_to_ptr.vmem [resolvable:$true] %s764_s5  ;;  %s788_s26 = int_to_ptr.vmem [resolvable:$true] %s787_s26 }
  0x82   : > { %s5744_s27 = sld [smem:[#allocation63_spill]] }
  0x88   : > { %s3964_s1 = scalar_lea.hbm %s5744_s27, 16 }
  0x89   : > { %p3965_p13 = scmp.ne.s32.totalorder %s5744_s27, %s3964_s1  ;;  %p3971_p5 = scmp.lt.u32.totalorder %s3964_s1, %s5744_s27 }
  0x8b   : > { %p3967_p0 = pnand %p3965_p13, %p4758_p8 }
  0x8d   : > { %p3968_p2 = pneg %p3967_p0 }
  0x8f   : > { %p3973_p7 = pnand %p3971_p5, %p3968_p2 }
  0x91   : > { %3976 = shalt.err (!%p3973_p7)
}
  0x92   : > { %s3977_s2 = scalar_lea.vmem %s765_s5, 16  ;;  %s3984_s10 = scalar_lea.vmem %s765_s5, 32 }
  0x93   : > { %p3978_p9 = scmp.ne.s32.totalorder %s765_s5, %s3977_s2  ;;  %p3985_p11 = scmp.lt.s32.totalorder %s765_s5, %s765_s5 }
  0x94   : > { %p3986_p12 = scmp.lt.s32.totalorder %s3984_s10, %s3977_s2 }
  0x95   : > { %p3980_p4 = pnand %p3978_p9, %p4758_p8 }
  0x96   : > { %p3987_p1 = por %p3986_p12, %p3985_p11 }
  0x97   : > { %p3981_p10 = pneg %p3980_p4 }
  0x99   : > { %p3988_p3 = pnand %p3987_p1, %p3981_p10 }
  0x9b   : > { %3991 = shalt.err (!%p3988_p3)
}
  0x9c   : > { %3659 = dma.hbm_to_vmem [thread:$0]  (!%p4742_p6), %s5744_s27, 16, %s765_s5, [#allocation19]  }
  0x9d   : > { %s5745_s13 = sld [smem:[#allocation64_spill]] }
  0xa3   : > { %s3992_s28 = scalar_lea.hbm %s5745_s13, 256 }
  0xa4   : > { %p3993_p13 = scmp.ne.s32.totalorder %s5745_s13, %s3992_s28  ;;  %p3999_p3 = scmp.lt.u32.totalorder %s3992_s28, %s5745_s13 }
  0xa6   : > { %p3995_p0 = pnand %p3993_p13, %p4758_p8 }
  0xa8   : > { %p3996_p1 = pneg %p3995_p0 }
  0xaa   : > { %p4001_p2 = pnand %p3999_p3, %p3996_p1 }
  0xac   : > { %4004 = shalt.err (!%p4001_p2)
}
  0xad   : > { %s4005_s2 = scalar_lea.vmem %s788_s26, 256  ;;  %p4013_p4 = scmp.lt.s32.totalorder %s788_s26, %s788_s26 }
  0xae   : > { %p4006_p5 = scmp.ne.s32.totalorder %s788_s26, %s4005_s2  ;;  %p4014_p10 = scmp.lt.s32.totalorder %s4005_s2, %s4005_s2 }
  0xb0   : > { %p4008_p7 = pnand %p4006_p5, %p4758_p8  ;;  %p4015_p11 = por %p4014_p10, %p4013_p4 }
  0xb2   : > { %p4009_p9 = pneg %p4008_p7 }
  0xb4   : > { %p4016_p12 = pnand %p4015_p11, %p4009_p9 }
  0xb6   : > { %4019 = shalt.err (!%p4016_p12)
}
  0xb7   : > { %s5746_s5 = smov 4   ;;  %s5747_s10 = smov 64  }
  0xb8   : > { %3665 = dma.hbm_to_vmem [thread:$0]  (!%p4742_p6), %s5745_s13, 256, %s788_s26, [#allocation22], %s5747_s10, %s5747_s10, %s5746_s5  }
  0xb9   : > { %s4529_s4 = smov [#allocation24]   ;;  %s4530_s28 = smov [#allocation27]  }
  0xba   : > { %s812_s11 = sshll.u32 %s4529_s4, 4  ;;  %s837_s17 = sshll.u32 %s4530_s28, 4  ;;  %s813_s11 = int_to_ptr.vmem [resolvable:$true] %s812_s11  ;;  %s838_s17 = int_to_ptr.vmem [resolvable:$true] %s837_s17 }
  0xbb   : > { %s5748_s15 = sld [smem:[#allocation65_spill]] }
  0xc1   : > { %s4020_s23 = scalar_lea.hbm %s5748_s15, 16 }
  0xc2   : > { %p4021_p13 = scmp.ne.s32.totalorder %s5748_s15, %s4020_s23  ;;  %p4027_p3 = scmp.lt.u32.totalorder %s4020_s23, %s5748_s15 }
  0xc4   : > { %p4023_p0 = pnand %p4021_p13, %p4758_p8 }
  0xc6   : > { %p4024_p1 = pneg %p4023_p0 }
  0xc8   : > { %p4029_p2 = pnand %p4027_p3, %p4024_p1 }
  0xca   : > { %4032 = shalt.err (!%p4029_p2)
}
  0xcb   : > { %s4033_s26 = scalar_lea.vmem %s813_s11, 16  ;;  %s4040_s3 = scalar_lea.vmem %s813_s11, 32 }
  0xcc   : > { %p4034_p5 = scmp.ne.s32.totalorder %s813_s11, %s4033_s26  ;;  %p4041_p4 = scmp.lt.s32.totalorder %s813_s11, %s813_s11 }
  0xcd   : > { %p4042_p10 = scmp.lt.s32.totalorder %s4040_s3, %s4033_s26 }
  0xce   : > { %p4036_p7 = pnand %p4034_p5, %p4758_p8 }
  0xcf   : > { %p4043_p11 = por %p4042_p10, %p4041_p4 }
  0xd0   : > { %p4037_p9 = pneg %p4036_p7 }
  0xd2   : > { %p4044_p12 = pnand %p4043_p11, %p4037_p9 }
  0xd4   : > { %4047 = shalt.err (!%p4044_p12)
}
  0xd5   : > { %3671 = dma.hbm_to_vmem [thread:$0]  (!%p4742_p6), %s5748_s15, 16, %s813_s11, [#allocation25]  }
  0xd6   : > { %s5749_s18 = sld [smem:[#allocation67_spill]] }
  0xdc   : > { %s4048_s1 = scalar_lea.hbm %s5749_s18, 16 }
  0xdd   : > { %p4049_p13 = scmp.ne.s32.totalorder %s5749_s18, %s4048_s1  ;;  %p4055_p3 = scmp.lt.u32.totalorder %s4048_s1, %s5749_s18 }
  0xdf   : > { %p4051_p0 = pnand %p4049_p13, %p4758_p8 }
  0xe1   : > { %p4052_p1 = pneg %p4051_p0 }
  0xe3   : > { %p4057_p2 = pnand %p4055_p3, %p4052_p1 }
  0xe5   : > { %4060 = shalt.err (!%p4057_p2)
}
  0xe6   : > { %s4061_s26 = scalar_lea.vmem %s838_s17, 16  ;;  %s4068_s11 = scalar_lea.vmem %s838_s17, 32 }
  0xe7   : > { %p4062_p5 = scmp.ne.s32.totalorder %s838_s17, %s4061_s26  ;;  %p4069_p4 = scmp.lt.s32.totalorder %s838_s17, %s838_s17 }
  0xe8   : > { %p4070_p10 = scmp.lt.s32.totalorder %s4068_s11, %s4061_s26 }
  0xe9   : > { %p4064_p7 = pnand %p4062_p5, %p4758_p8 }
  0xea   : > { %p4071_p11 = por %p4070_p10, %p4069_p4 }
  0xeb   : > { %p4065_p9 = pneg %p4064_p7 }
  0xed   : > { %p4072_p12 = pnand %p4071_p11, %p4065_p9 }
  0xef   : > { %4075 = shalt.err (!%p4072_p12)
}
  0xf0   : > { %3677 = dma.hbm_to_vmem [thread:$0]  (!%p4742_p6), %s5749_s18, 16, %s838_s17, [#allocation28]  }
  0xf1   : > { %s4531_s4 = smov [#allocation30]   ;;  %s5750_s21 = sld [smem:[#allocation68_spill]] }
  0xf2   : > { %s861_s25 = sshll.u32 %s4531_s4, 4  ;;  %s862_s25 = int_to_ptr.vmem [resolvable:$true] %s861_s25 }
  0xf7   : > { %s4076_s22 = scalar_lea.hbm %s5750_s21, 256 }
  0xf8   : > { %p4077_p13 = scmp.ne.s32.totalorder %s5750_s21, %s4076_s22  ;;  %p4083_p3 = scmp.lt.u32.totalorder %s4076_s22, %s5750_s21 }
  0xfa   : > { %p4079_p0 = pnand %p4077_p13, %p4758_p8 }
  0xfc   : > { %p4080_p1 = pneg %p4079_p0 }
  0xfe   : > { %p4085_p2 = pnand %p4083_p3, %p4080_p1 }
 0x100   : > { %4088 = shalt.err (!%p4085_p2)
}
 0x101   : > { %s4089_s17 = scalar_lea.vmem %s862_s25, 256  ;;  %p4097_p4 = scmp.lt.s32.totalorder %s862_s25, %s862_s25 }
 0x102   : > { %p4090_p5 = scmp.ne.s32.totalorder %s862_s25, %s4089_s17  ;;  %p4098_p10 = scmp.lt.s32.totalorder %s4089_s17, %s4089_s17 }
 0x104   : > { %p4092_p7 = pnand %p4090_p5, %p4758_p8  ;;  %p4099_p11 = por %p4098_p10, %p4097_p4 }
 0x106   : > { %p4093_p9 = pneg %p4092_p7 }
 0x108   : > { %p4100_p12 = pnand %p4099_p11, %p4093_p9 }
 0x10a   : > { %4103 = shalt.err (!%p4100_p12)
}
 0x10b   : > { %3683 = dma.hbm_to_vmem [thread:$0]  (!%p4742_p6), %s5750_s21, 256, %s862_s25, [#allocation31], %s5747_s10, %s5747_s10, %s5746_s5  }
 0x10c   : > { %s3178_s7 = sadd.s32 4294967294, %s4520_s9   ;;  %s4928_s4 = sadd.s32 1, %s4520_s9  }
 0x10d   : > { %5751 = sst [smem:[#allocation48_spill]] %s4928_s4  ;;  %s60_s28 = ssub.s32 %s4520_s9, %s4928_s4 }
 0x10e   : > { %s63_s1 = sadd.s32 1, %s4516_s20  ;;  %p61_p13 = scmp.eq.s32.totalorder %s60_s28, 0 }
 0x10f   : > { %p70_p0 = scmp.ne.s32.totalorder %s4516_s20, %s4512_s30  ;;  %p71_p1 = scmp.eq.s32.totalorder %s4520_s9, 0 }
 0x110   : > { %p76_p3 = scmp.ne.s32.totalorder %s4512_s30, %s4508_s8  ;;  %p5753_p5 = scmp.eq.s32.totalorder %s4726_s0, 0 }
 0x111   : > { %s4939_s22 = scalar_select %p61_p13, %s4516_s20, %s63_s1  }
 0x112   : > { %p72_p2 = por %p71_p1, %p70_p0  ;;  %p4943_p7 = por %p5753_p5, %p76_p3 }
 0x113   : > { %5752 = sst [smem:[#allocation49_spill]] %s4939_s22  ;;  %p661_p9 = scmp.eq.s32.totalorder %s4726_s0, 1 }
 0x114   : > { %s5754_s23 = scalar_select %p4943_p7, 1, 0 }
 0x115   : > { %p667_p4 = scmp.eq.s32.totalorder %s3178_s7, 1  ;;  %p3717_p10 = scmp.lt.s32.totalorder %s4520_s9, 2 }
 0x116   : > { %s4950_s25 = sand.u32 1, %s4516_s20   ;;  %p4952_p11 = por %p661_p9, %p70_p0 }
 0x117   : > { %p4956_p12 = por %p667_p4, %p76_p3  ;;  %s5691_s26 = sshll.u32 %s4950_s25, 3 }
 0x118   : > { %s5755_s2 = scalar_select %p4952_p11, 1, 0 }
 0x119   : > { %s5757_s24 = scalar_select %p4956_p12, 1, 0 }
 0x11a   : > { %5756 = sst [smem:[#allocation50_spill]] %s5755_s2  ;;  %s5692_s17 = sshll.u32 %s4520_s9, 7 }
 0x11b   : > { %5758 = sst [smem:[#allocation51_spill]] %s5757_s24  ;;  %p4962_p13 = pnand %p3717_p10, %p72_p2 }
 0x11c   : > { %s916_s3 = sand.u32 1, %s4520_s9   ;;  %s5760_s1 = sld [smem:[#allocation53_spill]] }
 0x11d   : > { %s5759_s11 = scalar_select %p4962_p13, 1, 0 }
 0x11e   : > { %s920_s15 = scalar_lea.vmem [#allocation6], %s5691_s26  ;;  %s4532_s21 = smov [#allocation11]  }
 0x11f   : > { %s927_s18 = sshll.u32 %s920_s15, 4  ;;  %s4978_s27 = sshll.u32 %s4532_s21, 4  ;;  %s4976_s18 = int_to_ptr.vmem [resolvable:$true] %s927_s18  ;;  %s703_s27 = int_to_ptr.vmem [resolvable:$true] %s4978_s27 }
 0x120   : > { %s4980_s22 = scalar_lea.sflag [#allocation7], %s916_s3  ;;  %p4986_p1 = pneg %p4962_p13 }
 0x122   : > { %s4972_s13 = scalar_lea.hbm %s5760_s1, %s5692_s17  ;;  %s4109_s26 = scalar_lea.hbm %s5760_s1, 256 }
 0x123   : > { %s4104_s20 = scalar_lea.hbm %s4972_s13, 128  ;;  %p4110_p5 = scmp.lt.u32.totalorder %s4972_s13, %s5760_s1 }
 0x124   : > { %p4105_p0 = scmp.ne.s32.totalorder %s4972_s13, %s4104_s20  ;;  %p4111_p9 = scmp.lt.u32.totalorder %s4109_s26, %s4104_s20 }
 0x125   : > { %s5761_s7 = scalar_select %p4986_p1, 1, 0 }
 0x126   : > { %p4107_p3 = pnand %p4986_p1, %p4105_p0  ;;  %p4112_p4 = por %p4111_p9, %p4110_p5 }
 0x127   : > { %p4113_p10 = scmp.lt.u32.totalorder %s4104_s20, %s4972_s13 }
 0x128   : > { %p4108_p2 = pneg %p4107_p3 }
 0x129   : > { %p4114_p12 = por %p4113_p10, %p4112_p4 }
 0x12b   : > { %p4115_p11 = pnand %p4114_p12, %p4108_p2 }
 0x12d   : > { %4118 = shalt.err (!%p4115_p11)
}
 0x12e   : > { %s4119_s3 = scalar_lea.vmem %s4976_s18, 128  ;;  %s4533_s28 = smov [#allocation6]  }
 0x12f   : > { %p4120_p0 = scmp.ne.s32.totalorder %s4976_s18, %s4119_s3  ;;  %s4124_s15 = sshll.u32 %s4533_s28, 4  ;;  %s4125_s15 = int_to_ptr.vmem [resolvable:$false] %s4124_s15 }
 0x130   : > { %s4126_s17 = scalar_lea.vmem %s4125_s15, 256  ;;  %p4127_p6 = scmp.lt.s32.totalorder %s4976_s18, %s4125_s15 }
 0x131   : > { %p4122_p3 = pnand %p4120_p0, %p4986_p1  ;;  %p4128_p8 = scmp.lt.s32.totalorder %s4126_s17, %s4119_s3 }
 0x133   : > { %p4123_p7 = pneg %p4122_p3  ;;  %p4129_p5 = por %p4128_p8, %p4127_p6 }
 0x135   : > { %p4130_p9 = pnand %p4129_p5, %p4123_p7 }
 0x137   : > { %4133 = shalt.err (!%p4130_p9)
}
 0x138   : > { %3693 = dma.hbm_to_vmem [thread:$0]  (!%p4962_p13), %s4972_s13, 128, %s4976_s18, %s4980_s22  }
 0x139   : > { %s5762_s21 = sld [smem:[#allocation58_spill]]  ;;  %p5763_p6 = scmp.ne.s32.totalorder %s5741_s29, 0 }
 0x13f   : > { %s4134_s28 = scalar_lea.hbm %s5762_s21, 256 }
 0x140   : > { %p4135_p11 = scmp.ne.s32.totalorder %s5762_s21, %s4134_s28  ;;  %p4141_p12 = scmp.lt.u32.totalorder %s4134_s28, %s5762_s21 }
 0x142   : > { %p4137_p8 = pnand %p4135_p11, %p5763_p6 }
 0x144   : > { %p4138_p7 = pneg %p4137_p8 }
 0x146   : > { %p4143_p2 = pnand %p4141_p12, %p4138_p7 }
 0x148   : > { %4146 = shalt.err (!%p4143_p2)
}
 0x149   : > { %s4147_s17 = scalar_lea.vmem %s703_s27, 256  ;;  %p4155_p3 = scmp.lt.s32.totalorder %s703_s27, %s703_s27 }
 0x14a   : > { %p4148_p4 = scmp.ne.s32.totalorder %s703_s27, %s4147_s17  ;;  %p4156_p5 = scmp.lt.s32.totalorder %s4147_s17, %s4147_s17 }
 0x14c   : > { %p4150_p10 = pnand %p4148_p4, %p5763_p6  ;;  %p4157_p9 = por %p4156_p5, %p4155_p3 }
 0x14e   : > { %p4151_p0 = pneg %p4150_p10 }
 0x150   : > { %p4158_p13 = pnand %p4157_p9, %p4151_p0 }
 0x152   : > { %4161 = shalt.err (!%p4158_p13)
}
 0x153   : > { %p5764_p11 = scmp.ne.s32.totalorder %s5739_s6, 0  ;;  %s4534_s4 = smov [#allocation14]  }
 0x154   : > { %s726_s1 = sshll.u32 %s4534_s4, 4  ;;  %s4535_s20 = smov [#allocation17]   ;;  %s727_s1 = int_to_ptr.vmem [resolvable:$true] %s726_s1 }
 0x155   : > { %3644 = dma.hbm_to_vmem [thread:$0]  (!%p5764_p11), %s5762_s21, 256, %s703_s27, [#allocation10], %s5747_s10, %s5747_s10, %s5746_s5  }
 0x156   : > { %s750_s26 = sshll.u32 %s4535_s20, 4  ;;  %s5765_s15 = sld [smem:[#allocation60_spill]]  ;;  %s751_s26 = int_to_ptr.vmem [resolvable:$true] %s750_s26 }
 0x15c   : > { %s4162_s17 = scalar_lea.hbm %s5765_s15, 256 }
 0x15d   : > { %p4163_p13 = scmp.ne.s32.totalorder %s5765_s15, %s4162_s17  ;;  %p4169_p12 = scmp.lt.u32.totalorder %s4162_s17, %s5765_s15 }
 0x15f   : > { %p4165_p8 = pnand %p4163_p13, %p5763_p6 }
 0x161   : > { %p4166_p7 = pneg %p4165_p8 }
 0x163   : > { %p4171_p2 = pnand %p4169_p12, %p4166_p7 }
 0x165   : > { %4174 = shalt.err (!%p4171_p2)
}
 0x166   : > { %s4175_s27 = scalar_lea.vmem %s727_s1, 256  ;;  %p4183_p3 = scmp.lt.s32.totalorder %s727_s1, %s727_s1 }
 0x167   : > { %p4176_p4 = scmp.ne.s32.totalorder %s727_s1, %s4175_s27  ;;  %p4184_p5 = scmp.lt.s32.totalorder %s4175_s27, %s4175_s27 }
 0x169   : > { %p4178_p10 = pnand %p4176_p4, %p5763_p6  ;;  %p4185_p9 = por %p4184_p5, %p4183_p3 }
 0x16b   : > { %p4179_p0 = pneg %p4178_p10 }
 0x16d   : > { %p4186_p1 = pnand %p4185_p9, %p4179_p0 }
 0x16f   : > { %4189 = shalt.err (!%p4186_p1)
}
 0x170   : > { %3650 = dma.hbm_to_vmem [thread:$0]  (!%p5764_p11), %s5765_s15, 256, %s727_s1, [#allocation13], %s5747_s10, %s5747_s10, %s5746_s5  }
 0x171   : > { %s5766_s4 = sld [smem:[#allocation62_spill]] }
 0x177   : > { %s4190_s20 = scalar_lea.hbm %s5766_s4, 256 }
 0x178   : > { %p4191_p13 = scmp.ne.s32.totalorder %s5766_s4, %s4190_s20  ;;  %p4197_p7 = scmp.lt.u32.totalorder %s4190_s20, %s5766_s4 }
 0x17a   : > { %p4193_p1 = pnand %p4191_p13, %p5763_p6 }
 0x17c   : > { %p4194_p8 = pneg %p4193_p1 }
 0x17e   : > { %p4199_p12 = pnand %p4197_p7, %p4194_p8 }
 0x180   : > { %4202 = shalt.err (!%p4199_p12)
}
 0x181   : > { %s4203_s27 = scalar_lea.vmem %s751_s26, 256  ;;  %p4211_p0 = scmp.lt.s32.totalorder %s751_s26, %s751_s26 }
 0x182   : > { %p4204_p2 = scmp.ne.s32.totalorder %s751_s26, %s4203_s27  ;;  %p4212_p3 = scmp.lt.s32.totalorder %s4203_s27, %s4203_s27 }
 0x184   : > { %p4206_p4 = pnand %p4204_p2, %p5763_p6  ;;  %p4213_p5 = por %p4212_p3, %p4211_p0 }
 0x186   : > { %p4207_p10 = pneg %p4206_p4 }
 0x188   : > { %p4214_p9 = pnand %p4213_p5, %p4207_p10 }
 0x18a   : > { %4217 = shalt.err (!%p4214_p9)
}
 0x18b   : > { %3656 = dma.hbm_to_vmem [thread:$0]  (!%p5764_p11), %s5766_s4, 256, %s751_s26, [#allocation16], %s5747_s10, %s5747_s10, %s5746_s5  }
 0x18c   : > { %s4536_s2 = smov [#allocation20]   ;;  %s4537_s18 = smov [#allocation23]  }
 0x18d   : > { %s774_s24 = sshll.u32 %s4536_s2, 4  ;;  %s801_s20 = sshll.u32 %s4537_s18, 4  ;;  %s775_s24 = int_to_ptr.vmem [resolvable:$true] %s774_s24  ;;  %s802_s20 = int_to_ptr.vmem [resolvable:$true] %s801_s20 }
 0x18e   : > { %s4218_s17 = scalar_lea.hbm %s5648_s12, 256 }
 0x18f   : > { %p4219_p13 = scmp.ne.s32.totalorder %s5648_s12, %s4218_s17  ;;  %p4225_p7 = scmp.lt.u32.totalorder %s4218_s17, %s5648_s12 }
 0x191   : > { %p4221_p1 = pnand %p4219_p13, %p5763_p6 }
 0x193   : > { %p4222_p8 = pneg %p4221_p1 }
 0x195   : > { %p4227_p12 = pnand %p4225_p7, %p4222_p8 }
 0x197   : > { %4230 = shalt.err (!%p4227_p12)
}
 0x198   : > { %s4231_s26 = scalar_lea.vmem %s775_s24, 256  ;;  %p4239_p0 = scmp.lt.s32.totalorder %s775_s24, %s775_s24 }
 0x199   : > { %p4232_p2 = scmp.ne.s32.totalorder %s775_s24, %s4231_s26  ;;  %p4240_p3 = scmp.lt.s32.totalorder %s4231_s26, %s4231_s26 }
 0x19b   : > { %p4234_p4 = pnand %p4232_p2, %p5763_p6  ;;  %p4241_p5 = por %p4240_p3, %p4239_p0 }
 0x19d   : > { %p4235_p10 = pneg %p4234_p4 }
 0x19f   : > { %p4242_p9 = pnand %p4241_p5, %p4235_p10 }
 0x1a1   : > { %4245 = shalt.err (!%p4242_p9)
}
 0x1a2   : > { %3662 = dma.hbm_to_vmem [thread:$0]  (!%p5764_p11), %s5648_s12, 256, %s775_s24, [#allocation19], %s5747_s10, %s5747_s10, %s5746_s5  }
 0x1a3   : > { %s4246_s28 = scalar_lea.hbm %s5650_s14, 16 }
 0x1a4   : > { %p4247_p13 = scmp.ne.s32.totalorder %s5650_s14, %s4246_s28  ;;  %p4253_p7 = scmp.lt.u32.totalorder %s4246_s28, %s5650_s14 }
 0x1a6   : > { %p4249_p1 = pnand %p4247_p13, %p5763_p6 }
 0x1a8   : > { %p4250_p8 = pneg %p4249_p1 }
 0x1aa   : > { %p4255_p12 = pnand %p4253_p7, %p4250_p8 }
 0x1ac   : > { %4258 = shalt.err (!%p4255_p12)
}
 0x1ad   : > { %s4259_s1 = scalar_lea.vmem %s802_s20, 16  ;;  %s4266_s5 = scalar_lea.vmem %s802_s20, 32 }
 0x1ae   : > { %p4260_p2 = scmp.ne.s32.totalorder %s802_s20, %s4259_s1  ;;  %p4267_p0 = scmp.lt.s32.totalorder %s802_s20, %s802_s20 }
 0x1af   : > { %p4268_p3 = scmp.lt.s32.totalorder %s4266_s5, %s4259_s1 }
 0x1b0   : > { %p4262_p4 = pnand %p4260_p2, %p5763_p6 }
 0x1b1   : > { %p4269_p5 = por %p4268_p3, %p4267_p0 }
 0x1b2   : > { %p4263_p10 = pneg %p4262_p4 }
 0x1b4   : > { %p4270_p9 = pnand %p4269_p5, %p4263_p10 }
 0x1b6   : > { %4273 = shalt.err (!%p4270_p9)
}
 0x1b7   : > { %3668 = dma.hbm_to_vmem [thread:$0]  (!%p5764_p11), %s5650_s14, 16, %s802_s20, [#allocation22]  }
 0x1b8   : > { %s4538_s26 = smov [#allocation26]   ;;  %s4539_s8 = smov [#allocation29]  }
 0x1b9   : > { %s823_s15 = sshll.u32 %s4538_s26, 4  ;;  %s848_s2 = sshll.u32 %s4539_s8, 4  ;;  %s824_s15 = int_to_ptr.vmem [resolvable:$true] %s823_s15  ;;  %s849_s2 = int_to_ptr.vmem [resolvable:$true] %s848_s2 }
 0x1ba   : > { %s4274_s3 = scalar_lea.hbm %s5652_s16, 16 }
 0x1bb   : > { %p4275_p13 = scmp.ne.s32.totalorder %s5652_s16, %s4274_s3  ;;  %p4281_p7 = scmp.lt.u32.totalorder %s4274_s3, %s5652_s16 }
 0x1bd   : > { %p4277_p1 = pnand %p4275_p13, %p5763_p6 }
 0x1bf   : > { %p4278_p8 = pneg %p4277_p1 }
 0x1c1   : > { %p4283_p12 = pnand %p4281_p7, %p4278_p8 }
 0x1c3   : > { %4286 = shalt.err (!%p4283_p12)
}
 0x1c4   : > { %s4287_s20 = scalar_lea.vmem %s824_s15, 16  ;;  %s4294_s5 = scalar_lea.vmem %s824_s15, 32 }
 0x1c5   : > { %p4288_p2 = scmp.ne.s32.totalorder %s824_s15, %s4287_s20  ;;  %p4295_p0 = scmp.lt.s32.totalorder %s824_s15, %s824_s15 }
 0x1c6   : > { %p4296_p3 = scmp.lt.s32.totalorder %s4294_s5, %s4287_s20 }
 0x1c7   : > { %p4290_p4 = pnand %p4288_p2, %p5763_p6 }
 0x1c8   : > { %p4297_p5 = por %p4296_p3, %p4295_p0 }
 0x1c9   : > { %p4291_p10 = pneg %p4290_p4 }
 0x1cb   : > { %p4298_p9 = pnand %p4297_p5, %p4291_p10 }
 0x1cd   : > { %4301 = shalt.err (!%p4298_p9)
}
 0x1ce   : > { %3674 = dma.hbm_to_vmem [thread:$0]  (!%p5764_p11), %s5652_s16, 16, %s824_s15, [#allocation25]  }
 0x1cf   : > { %s4302_s18 = scalar_lea.hbm %s5655_s19, 16 }
 0x1d0   : > { %p4303_p13 = scmp.ne.s32.totalorder %s5655_s19, %s4302_s18  ;;  %p4309_p7 = scmp.lt.u32.totalorder %s4302_s18, %s5655_s19 }
 0x1d2   : > { %p4305_p1 = pnand %p4303_p13, %p5763_p6 }
 0x1d4   : > { %p4306_p8 = pneg %p4305_p1 }
 0x1d6   : > { %p4311_p12 = pnand %p4309_p7, %p4306_p8 }
 0x1d8   : > { %4314 = shalt.err (!%p4311_p12)
}
 0x1d9   : > { %s4315_s27 = scalar_lea.vmem %s849_s2, 16  ;;  %s4322_s15 = scalar_lea.vmem %s849_s2, 32 }
 0x1da   : > { %p4316_p2 = scmp.ne.s32.totalorder %s849_s2, %s4315_s27  ;;  %p4323_p0 = scmp.lt.s32.totalorder %s849_s2, %s849_s2 }
 0x1db   : > { %p4324_p3 = scmp.lt.s32.totalorder %s4322_s15, %s4315_s27 }
 0x1dc   : > { %p4318_p4 = pnand %p4316_p2, %p5763_p6 }
 0x1dd   : > { %p4325_p5 = por %p4324_p3, %p4323_p0 }
 0x1de   : > { %p4319_p10 = pneg %p4318_p4 }
 0x1e0   : > { %p4326_p9 = pnand %p4325_p5, %p4319_p10 }
 0x1e2   : > { %4329 = shalt.err (!%p4326_p9)
}
 0x1e3   : > { %3680 = dma.hbm_to_vmem [thread:$0]  (!%p5764_p11), %s5655_s19, 16, %s849_s2, [#allocation28]  }
 0x1e4   : > { %s4540_s5 = smov [#allocation32]   ;;  %s5767_s8 = sld [smem:[#allocation69_spill]] }
 0x1e5   : > { %s875_s10 = sshll.u32 %s4540_s5, 4  ;;  %s876_s10 = int_to_ptr.vmem [resolvable:$true] %s875_s10 }
 0x1ea   : > { %s5768_s18 = smov %s5767_s8  ;;  %s4330_s28 = scalar_lea.hbm %s5767_s8, 16 }
 0x1eb   : > { %p4331_p13 = scmp.ne.s32.totalorder %s5768_s18, %s4330_s28  ;;  %p4337_p7 = scmp.lt.u32.totalorder %s4330_s28, %s5768_s18 }
 0x1ed   : > { %p4333_p1 = pnand %p4331_p13, %p5763_p6 }
 0x1ef   : > { %p4334_p8 = pneg %p4333_p1 }
 0x1f1   : > { %p4339_p12 = pnand %p4337_p7, %p4334_p8 }
 0x1f3   : > { %4342 = shalt.err (!%p4339_p12)
}
 0x1f4   : > { %s4343_s2 = scalar_lea.vmem %s876_s10, 16  ;;  %s4350_s15 = scalar_lea.vmem %s876_s10, 32 }
 0x1f5   : > { %p4344_p2 = scmp.ne.s32.totalorder %s876_s10, %s4343_s2  ;;  %p4351_p0 = scmp.lt.s32.totalorder %s876_s10, %s876_s10 }
 0x1f6   : > { %p4352_p3 = scmp.lt.s32.totalorder %s4350_s15, %s4343_s2 }
 0x1f7   : > { %p4346_p4 = pnand %p4344_p2, %p5763_p6 }
 0x1f8   : > { %p4353_p5 = por %p4352_p3, %p4351_p0 }
 0x1f9   : > { %p4347_p10 = pneg %p4346_p4 }
 0x1fb   : > { %p4354_p9 = pnand %p4353_p5, %p4347_p10 }
 0x1fd   : > { %4357 = shalt.err (!%p4354_p9)
}
 0x1fe   : > { %3686 = dma.hbm_to_vmem [thread:$0]  (!%p5764_p11), %s5768_s18, 16, %s876_s10, [#allocation31]  }
 0x1ff   : > { %s5769_s5 = sshll.u32 %s4520_s9, 7  ;;  %s5770_s26 = sld [smem:[#allocation52_spill]] }
 0x200   : > { %s5771_s28 = sshll.u32 %s4950_s25, 3  ;;  %s899_s17 = scalar_lea.sflag [#allocation4], %s4950_s25 }
 0x201   : > { %s902_s6 = scalar_lea.vmem [#allocation3], %s5771_s28  ;;  %p5772_p13 = scmp.ne.s32.totalorder %s5761_s7, 0 }
 0x202   : > { %s909_s3 = sshll.u32 %s902_s6, 4  ;;  %s910_s3 = int_to_ptr.vmem [resolvable:$true] %s909_s3 }
 0x205   : > { %s5172_s8 = scalar_lea.hbm %s5770_s26, %s5769_s5  ;;  %s4363_s2 = scalar_lea.hbm %s5770_s26, 256 }
 0x206   : > { %s4358_s13 = scalar_lea.hbm %s5172_s8, 128  ;;  %p4364_p8 = scmp.lt.u32.totalorder %s5172_s8, %s5770_s26 }
 0x207   : > { %p4359_p6 = scmp.ne.s32.totalorder %s5172_s8, %s4358_s13  ;;  %p4365_p7 = scmp.lt.u32.totalorder %s4363_s2, %s4358_s13 }
 0x208   : > { %p4367_p2 = scmp.lt.u32.totalorder %s4358_s13, %s5172_s8 }
 0x209   : > { %p4361_p1 = pnand %p4359_p6, %p5772_p13  ;;  %p4366_p12 = por %p4365_p7, %p4364_p8 }
 0x20b   : > { %p4362_p11 = pneg %p4361_p1  ;;  %p4368_p4 = por %p4367_p2, %p4366_p12 }
 0x20d   : > { %p4369_p10 = pnand %p4368_p4, %p4362_p11 }
 0x20f   : > { %4372 = shalt.err (!%p4369_p10)
}
 0x210   : > { %s4373_s20 = scalar_lea.vmem %s910_s3, 128  ;;  %s4541_s5 = smov [#allocation3]  }
 0x211   : > { %p4374_p0 = scmp.ne.s32.totalorder %s910_s3, %s4373_s20  ;;  %s4378_s29 = sshll.u32 %s4541_s5, 4  ;;  %s4379_s29 = int_to_ptr.vmem [resolvable:$false] %s4378_s29 }
 0x212   : > { %s4380_s24 = scalar_lea.vmem %s4379_s29, 256  ;;  %p4381_p9 = scmp.lt.s32.totalorder %s910_s3, %s4379_s29 }
 0x213   : > { %p4376_p3 = pnand %p4374_p0, %p5772_p13  ;;  %p4382_p6 = scmp.lt.s32.totalorder %s4380_s24, %s4373_s20 }
 0x215   : > { %p4377_p5 = pneg %p4376_p3  ;;  %p4383_p1 = por %p4382_p6, %p4381_p9 }
 0x217   : > { %p4384_p7 = pnand %p4383_p1, %p4377_p5 }
 0x219   : > { %4387 = shalt.err (!%p4384_p7)
}
 0x21a   : > { %p5773_p8 = scmp.ne.s32.totalorder %s5759_s11, 0  ;;  %s3201_s28 = sshll.u32 %s4520_s9, 4 }
 0x21b   : > { %s944_s6 = scalar_lea.vmem [#allocation8], %s4950_s25  ;;  %s5774_s2 = sld [smem:[#allocation55_spill]] }
 0x21c   : > { %3690 = dma.hbm_to_vmem [thread:$0]  (!%p5773_p8), %s5172_s8, 128, %s910_s3, %s899_s17  }
 0x21d   : > { %s951_s13 = sshll.u32 %s944_s6, 4  ;;  %s952_s13 = int_to_ptr.vmem [resolvable:$true] %s951_s13 }
 0x221   : > { %s949_s15 = scalar_lea.hbm %s5774_s2, %s3201_s28  ;;  %s4393_s29 = scalar_lea.hbm %s5774_s2, 32 }
 0x222   : > { %s4388_s1 = scalar_lea.hbm %s949_s15, 16  ;;  %p4394_p4 = scmp.lt.u32.totalorder %s949_s15, %s5774_s2 }
 0x223   : > { %p4389_p11 = scmp.ne.s32.totalorder %s949_s15, %s4388_s1  ;;  %p4395_p10 = scmp.lt.u32.totalorder %s4393_s29, %s4388_s1 }
 0x224   : > { %p4397_p3 = scmp.lt.u32.totalorder %s4388_s1, %s949_s15 }
 0x225   : > { %p4391_p12 = pnand %p4389_p11, %p5772_p13  ;;  %p4396_p0 = por %p4395_p10, %p4394_p4 }
 0x227   : > { %p4392_p2 = pneg %p4391_p12  ;;  %p4398_p5 = por %p4397_p3, %p4396_p0 }
 0x229   : > { %p4399_p9 = pnand %p4398_p5, %p4392_p2 }
 0x22b   : > { %4402 = shalt.err (!%p4399_p9)
}
 0x22c   : > { %s4403_s25 = scalar_lea.vmem %s952_s13, 16  ;;  %s4542_s8 = smov [#allocation8]  }
 0x22d   : > { %p4404_p6 = scmp.ne.s32.totalorder %s952_s13, %s4403_s25  ;;  %s4408_s3 = sshll.u32 %s4542_s8, 4  ;;  %s4409_s3 = int_to_ptr.vmem [resolvable:$false] %s4408_s3 }
 0x22e   : > { %s4410_s17 = scalar_lea.vmem %s4409_s3, 32  ;;  %p4411_p11 = scmp.lt.s32.totalorder %s952_s13, %s4409_s3 }
 0x22f   : > { %p4406_p1 = pnand %p4404_p6, %p5772_p13  ;;  %p4412_p12 = scmp.lt.s32.totalorder %s4410_s17, %s4403_s25 }
 0x231   : > { %p4407_p7 = pneg %p4406_p1  ;;  %p4413_p8 = por %p4412_p12, %p4411_p11 }
 0x233   : > { %p4414_p4 = pnand %p4413_p8, %p4407_p7 }
 0x235   : > { %4417 = shalt.err (!%p4414_p4)
}
 0x236   : > { %p5775_p10 = scmp.ne.s32.totalorder %s5759_s11, 0  ;;  %s5776_s4 = sld [smem:[#allocation47_spill]] }
 0x238   : > { %3696 = dma.hbm_to_vmem [thread:$0]  (!%p5775_p10), %s949_s15, 16, %s952_s13, %s4980_s22  }
 0x23c   : > { %p5777_p2 = scmp.ne.s32.totalorder %s5776_s4, 0 }
 0x23d   : > { %s5215_s7 = sand.u32 (!%p5777_p2), 1, %s4512_s30   ;;  %p5778_p13 = scmp.ne.s32.totalorder (!%p5777_p2), %s5754_s23, 0 }
 0x23e   : > { %960 = sbr.rel (%p5777_p2) target bundleno = 3917 (0xf4d), region = 128  ;;  %s3203_s28 = sshll.u32 (!%p5777_p2), %s5215_s7, 3 }
 0x23f   : > { %s963_s6 = scalar_lea.sflag (!%p5777_p2), [#allocation4], %s5215_s7  ;;  %s5219_s10 = scalar_lea.vmem (!%p5777_p2), [#allocation3], %s3203_s28 }
 0x245   : > { %4463 = dma.done.wait (%p5778_p13), %s963_s6, 128  }
 0x246   : > { %4465 = vsyncadd (%p5778_p13), %s963_s6, 4294967168  ;;  %s971_s22 = sand.u32 1, %s4726_s0   ;;  %s5226_s13 = scalar_lea.vmem [#allocation6], %s3203_s28 }
 0x247   : > { %s972_s11 = scalar_lea.sflag [#allocation7], %s971_s22 }
 0x248   : > { %4467 = dma.done.wait (%p5778_p13), %s972_s11, 144  }
 0x249   : > { %4469 = vsyncadd (%p5778_p13), %s972_s11, 4294967152  ;;  %s983_s27 = scalar_lea.vmem [#allocation8], %s5215_s7  ;;  %p5779_p8 = scmp.eq.s32.totalorder %s4726_s0, 0 }
 0x24b   : > { %4471 = dma.done.wait (%p5779_p8), [#allocation10], 512   ;;  %p5780_p0 = pmov %p5779_p8 }
 0x24d   : > { %4473 = vsyncadd (%p5780_p0), [#allocation10], 4294966784  ;;  %p5781_p3 = pmov %p5780_p0 }
 0x24e   : > { %p5782_p5 = pmov %p5780_p0 }
 0x24f   : > { %4475 = dma.done.wait (%p5781_p3), [#allocation13], 272  }
 0x250   : > { %4477 = vsyncadd (%p5782_p5), [#allocation13], 4294967024  ;;  %p5783_p9 = pmov %p5780_p0 }
 0x251   : > { %p5784_p6 = pmov %p5780_p0 }
 0x252   : > { %4479 = dma.done.wait (%p5783_p9), [#allocation16], 272  }
 0x253   : > { %4481 = vsyncadd (%p5784_p6), [#allocation16], 4294967024  ;;  %p5785_p1 = pmov %p5780_p0 }
 0x254   : > { %p5786_p7 = pmov %p5780_p0 }
 0x255   : > { %4483 = dma.done.wait (%p5785_p1), [#allocation19], 272  }
 0x256   : > { %4485 = vsyncadd (%p5786_p7), [#allocation19], 4294967024  ;;  %p5787_p11 = pmov %p5780_p0 }
 0x257   : > { %p5788_p12 = pmov %p5780_p0 }
 0x258   : > { %4487 = dma.done.wait (%p5787_p11), [#allocation22], 272  }
 0x259   : > { %4489 = vsyncadd (%p5788_p12), [#allocation22], 4294967024  ;;  %p5789_p4 = pmov %p5780_p0 }
 0x25a   : > { %p5790_p10 = pmov %p5780_p0 }
 0x25b   : > { %4491 = dma.done.wait (%p5789_p4), [#allocation25], 32  }
 0x25c   : > { %4493 = vsyncadd (%p5790_p10), [#allocation25], 4294967264  ;;  %p5791_p2 = pmov %p5780_p0 }
 0x25d   : > { %p5792_p13 = pmov %p5780_p0 }
 0x25e   : > { %4495 = dma.done.wait (%p5791_p2), [#allocation28], 32  }
 0x25f   : > { %4497 = vsyncadd (%p5792_p13), [#allocation28], 4294967264  ;;  %p5793_p8 = pmov %p5780_p0 }
 0x261   : > { %4499 = dma.done.wait (%p5793_p8), [#allocation31], 272  }
 0x262   : > { %4501 = vsyncadd (%p5780_p0), [#allocation31], 4294967024  ;;  %v4543_v1 = vmov 0.0   ;;  %vm4544_vm0 = vmmov 0   ;;  %v3804_v2 = vld [vmem:[#allocation11] sm:$0xff]   ;;  %v3805_v3 = vld [vmem:[#allocation9] sm:$0xff]   ;;  %v1343_v48 = vlaneseq }
 0x263   : > { %3374 = vmatprep.subr.bf16.mxu1 %v4543_v1  ;;  %3366 = vmatprep.subr.bf16.mxu0 %v4543_v1  ;;  %v3806_v4 = vld [vmem:[#allocation11 + $0x8] sm:$0xff]   ;;  %vm1164_vm1 = vcmask 261120   ;;  %v3807_v6 = vld [vmem:[#allocation9 + $0x8] sm:$0xff]   ;;  %v3226_v10 = vld [vmem:[#allocation12] ss:$0 sm:$0xff]  ;;  %s5794_s1 = sld [smem:[#allocation57_spill]] }
 0x264   : > { %3378 = vmatprep.mubr.msk.bf16.mxu1 %vm4544_vm0, %v4543_v1  ;;  %3370 = vmatprep.mubr.msk.bf16.mxu0 %vm4544_vm0, %v4543_v1  ;;  %v1136_v5 = vld [vmem:[%s5226_s13] sm:$0xff]  ;;  %v5275_v7 = vld [vmem:[%s5219_s10] sm:$0xff]  ;;  %vm1348_vm2 = vcmask 31744   ;;  %s4545_s20 = smov 120   ;;  %s4546_s5 = smov 124   ;;  %v1344_v50 = vshrl.u32 %v1343_v48, 7 }
 0x265   : > { %3375 = vmatpush3.bf16.msra.mxu1 %v3804_v2  ;;  %3367 = vmatpush3.bf16.msra.mxu0 %v3805_v3  ;;  %v1140_v8 = vpack.c.bf16 %v1136_v5, %v1136_v5  ;;  %v5279_v9 = vpack.c.bf16 %v5275_v7, %v5275_v7  ;;  %s4547_s29 = smov 116   ;;  %s4548_s24 = smov 112   ;;  %v3808_v25 = vld [vmem:[#allocation14] sm:$0xff]   ;;  %v3809_v26 = vld [vmem:[#allocation14 + $0x8] sm:$0xff]   ;;  %v1138_v49 = vld [vmem:[%s983_s27] sm:$0x1] }
 0x266   : > { %3376 = vmatprep.subr.bf16.mxu1 %v4543_v1  ;;  %3368 = vmatprep.subr.bf16.mxu0 %v4543_v1  ;;  %s4549_s25 = smov 108   ;;  %s4550_s8 = smov 104   ;;  %vm1340_vm3 = vcmp.gt.f32.partialorder %v1138_v49, 0.0  ;;  %v1345_v51 = vsub.s32 0, %v1344_v50  ;;  %v4552_v52 = vmov -1e+09  }
 0x267   : > { %s4551_s3 = smov 100   ;;  %v1341_v53 = vsel %vm1340_vm3, 0.0, %v4552_v52  ;;  %vm1395_vm4 = vcmask 64512   ;;  %v3230_v61 = vld [vmem:[#allocation15] ss:$0 sm:$0xff]  ;;  %vm1411_vm5 = vcmask 1043456  }
 0x268   : > { %v5354_v54 = vrot.slane %v1341_v53, %v1345_v51  ;;  %s4553_s17 = smov 4   ;;  %s4554_s4 = smov 8   ;;  %vm2258_vm6 = vcmask 97280   ;;  %vm2260_vm7 = vcmask 130048   ;;  %vm2262_vm8 = vcmask 162816  }
 0x269   : > { %3377 = vmatpush3.bf16.msra.mxu1 %v3806_v4  ;;  %3369 = vmatpush3.bf16.msra.mxu0 %v3807_v6  ;;  %v3222_v11 = vld [vmem:[%s5794_s1] ss:$0 sm:$0xff]  ;;  %s4555_s28 = smov 12   ;;  %s4556_s6 = smov 16   ;;  %vm2264_vm9 = vcmask 195584   ;;  %vm2266_vm10 = vcmask 228352  }
 0x26a   : > { %3390 = vmatprep.subr.bf16.mxu1 %v4543_v1  ;;  %3382 = vmatprep.subr.bf16.mxu0 %v4543_v1  ;;  %s4557_s10 = smov 20   ;;  %s4558_s22 = smov 24   ;;  %vm2586_vm12 = vcmask 7168  }
 0x26b   : > { %s4559_s11 = smov 28   ;;  %s5795_s23 = sld [smem:[#allocation66_spill]] }
 0x26c   : > { %3379 = vmatmul.mubr.msk.bf16.vlgmr.msra.gmra.mrb[0].mxu1 %vm1164_vm1, %v1140_v8  ;;  %3371 = vmatmul.mubr.msk.bf16.vlgmr.msra.gmra.mrb[0].mxu0 %vm1164_vm1, %v5279_v9  ;;  %p1130_p3 = scmp.lt.s32.totalorder %s4726_s0, 1  ;;  %s3289_s13 = sshll.u32 %s4726_s0, 4 }
 0x26d   : > { %3392 = vmatprep.mubr.msk.bf16.mxu1 %vm4544_vm0, %v4543_v1  ;;  %3386 = vmatprep.mubr.msk.bf16.mxu0 %vm4544_vm0, %v4543_v1  ;;  %s1129_s27 = scalar_lea.vmem [#allocation33], %s5215_s7 }
 0x26e   : > { %3383 = vmatpush3.bf16.msra.mxu0 %v3808_v25  ;;  %s2908_s15 = sshll.u32 %s1129_s27, 4  ;;  %s5594_s15 = int_to_ptr.vmem [resolvable:$true] %s2908_s15 }
 0x26f   : > { %3384 = vmatprep.subr.bf16.mxu0 %v4543_v1 }
 0x272   : > { %3385 = vmatpush3.bf16.msra.mxu0 %v3809_v26 }
 0x273   : > { %3396 = vmatprep.subr.bf16.mxu0 %v4543_v1 }
 0x275   : > { %3387 = vmatmul.mubr.msk.bf16.vlgmr.msra.gmra.mrb[4].mxu0 %vm1164_vm1, %v1140_v8 }
 0x276   : > { %3398 = vmatprep.mubr.msk.bf16.mxu0 %vm4544_vm0, %v4543_v1 }
 0x33f   : > { %v1268_v12 = vpop.f32.mrb[0].mxu1  ;;  %v1202_v15 = vpop.f32.mrb[0].mxu0 }
 0x340   : > { %v1269_v13 = vadd.f32 %v3226_v10, %v1268_v12  ;;  %v3380_v14 = vpop.f32.mrb[1].mxu1  ;;  %v1203_v17 = vadd.f32 %v3222_v11, %v1202_v15  ;;  %v3372_v18 = vpop.f32.mrb[1].mxu0 }
 0x341   : > { %v1271_v16 = vpop.f32.mrb[2].mxu1  ;;  %v1205_v21 = vpop.f32.mrb[2].mxu0 }
 0x342   : > { %v1338_v19 = vpack.c.bf16 %v1269_v13, %v1269_v13  ;;  %v3381_v20 = vpop.f32.mrb[3].mxu1  ;;  %v3373_v22 = vpop.f32.mrb[3].mxu0  ;;  %v1337_v23 = vpack.c.bf16 %v1203_v17, %v1203_v17 }
 0x344   : > { %1570 = vrot.lane.b32.xlu1 %v1338_v19, %s4545_s20  ;;  %1459 = vrot.lane.b32.xlu0 %v1338_v19, %s4546_s5  ;;  %v1353_v24 = vsel %vm1348_vm2, %v1338_v19, 0 }
 0x345   : > { %3391 = vmatpush3.bf16.xpose.msra.mxu1 %v1353_v24 }
 0x346   : > { %3402 = vmatprep.subr.bf16.mxu1 %v4543_v1 }
 0x348   : > { %1568 = vrot.lane.b32.xlu1 %v1337_v23, %s4545_s20  ;;  %1456 = vrot.lane.b32.xlu0 %v1337_v23, %s4546_s5  ;;  %v1331_v62 = vpop.f32.mrb[4].mxu0 }
 0x349   : > { %v1332_v63 = vadd.f32 %v3230_v61, %v1331_v62  ;;  %v3388_v0 = vpop.f32.mrb[5].mxu0 }
 0x34a   : > { %v1334_v2 = vpop.f32.mrb[6].mxu0 }
 0x34b   : > { %v5358_v3 = vpack.c.bf16 %v1332_v63, %v1332_v63  ;;  %v3389_v4 = vpop.f32.mrb[7].mxu0 }
 0x34c   : > { %1678 = vrot.lane.b32.xlu1 %v1337_v23, %s4547_s29  ;;  %1680 = vrot.lane.b32.xlu0 %v1338_v19, %s4547_s29 }
 0x34d   : > { %3393 = vmatmul.mubr.msk.bf16.vlgmr.msra.gmra.mrb[4].mxu1 %vm1348_vm2, %v1337_v23  ;;  %v1413_v5 = vsel %vm1411_vm5, %v5358_v3, 0 }
 0x34e   : > { %3404 = vmatprep.mubr.msk.bf16.mxu1 %vm4544_vm0, %v4543_v1  ;;  %3397 = vmatpush3.bf16.msra.mxu0 %v1413_v5 }
 0x34f   : > { %3408 = vmatprep.subr.bf16.mxu0 %v4543_v1 }
 0x350   : > { %1788 = vrot.lane.b32.xlu1 %v1337_v23, %s4548_s24  ;;  %1790 = vrot.lane.b32.xlu0 %v1338_v19, %s4548_s24 }
 0x354   : > { %1898 = vrot.lane.b32.xlu1 %v1337_v23, %s4549_s25  ;;  %1900 = vrot.lane.b32.xlu0 %v1338_v19, %s4549_s25 }
 0x358   : > { %2008 = vrot.lane.b32.xlu1 %v1337_v23, %s4550_s8  ;;  %2010 = vrot.lane.b32.xlu0 %v1338_v19, %s4550_s8 }
 0x35c   : > { %2118 = vrot.lane.b32.xlu1 %v1337_v23, %s4551_s3  ;;  %2120 = vrot.lane.b32.xlu0 %v1338_v19, %s4551_s3 }
 0x3b6   : > { %v1460_v27 = vpop.permute.xlu0 %1459  ;;  %v1571_v29 = vpop.permute.xlu1 %1570 }
 0x3b7   : > { %v1465_v28 = vsel %vm1348_vm2, %v1460_v27, 0  ;;  %v1576_v31 = vsel %vm1348_vm2, %v1571_v29, 0 }
 0x3b8   : > { %3403 = vmatpush3.bf16.xpose.msra.mxu1 %v1465_v28 }
 0x3b9   : > { %3414 = vmatprep.subr.bf16.mxu1 %v4543_v1 }
 0x3ba   : > { %v1457_v30 = vpop.permute.xlu0 %1456  ;;  %v1569_v33 = vpop.permute.xlu1 %1568 }
 0x3be   : > { %v1681_v32 = vpop.permute.xlu0 %1680  ;;  %v1679_v36 = vpop.permute.xlu1 %1678 }
 0x3bf   : > { %3405 = vmatmul.mubr.msk.bf16.vlgmr.msra.gmra.mrb[8].mxu1 %vm1348_vm2, %v1457_v30  ;;  %v1686_v34 = vsel %vm1348_vm2, %v1681_v32, 0 }
 0x3c0   : > { %3415 = vmatpush3.bf16.xpose.msra.mxu1 %v1576_v31  ;;  %3416 = vmatprep.mubr.msk.bf16.mxu1 %vm4544_vm0, %v4543_v1 }
 0x3c1   : > { %3426 = vmatprep.subr.bf16.mxu1 %v4543_v1 }
 0x3c2   : > { %v1791_v35 = vpop.permute.xlu0 %1790  ;;  %v1789_v39 = vpop.permute.xlu1 %1788 }
 0x3c3   : > { %v1796_v37 = vsel %vm1348_vm2, %v1791_v35, 0 }
 0x3c6   : > { %v1901_v38 = vpop.permute.xlu0 %1900  ;;  %v1899_v42 = vpop.permute.xlu1 %1898 }
 0x3c7   : > { %3417 = vmatmul.mubr.msk.bf16.vlgmr.msra.gmra.mrb[12].mxu1 %vm1348_vm2, %v1569_v33  ;;  %v1906_v40 = vsel %vm1348_vm2, %v1901_v38, 0 }
 0x3c8   : > { %3427 = vmatpush3.bf16.xpose.msra.mxu1 %v1686_v34  ;;  %3428 = vmatprep.mubr.msk.bf16.mxu1 %vm4544_vm0, %v4543_v1 }
 0x3c9   : > { %3438 = vmatprep.subr.bf16.mxu1 %v4543_v1 }
 0x3ca   : > { %v2011_v41 = vpop.permute.xlu0 %2010  ;;  %v2009_v45 = vpop.permute.xlu1 %2008 }
 0x3cb   : > { %v2016_v43 = vsel %vm1348_vm2, %v2011_v41, 0 }
 0x3ce   : > { %v2121_v44 = vpop.permute.xlu0 %2120  ;;  %v2119_v47 = vpop.permute.xlu1 %2118 }
 0x3cf   : > { %3429 = vmatmul.mubr.msk.bf16.vlgmr.msra.gmra.mrb[16].mxu1 %vm1348_vm2, %v1679_v36  ;;  %v2126_v46 = vsel %vm1348_vm2, %v2121_v44, 0 }
 0x3d0   : > { %3439 = vmatpush3.bf16.xpose.msra.mxu1 %v1796_v37  ;;  %3440 = vmatprep.mubr.msk.bf16.mxu1 %vm4544_vm0, %v4543_v1 }
 0x3d1   : > { %3450 = vmatprep.subr.bf16.mxu1 %v4543_v1 }
 0x3d7   : > { %3441 = vmatmul.mubr.msk.bf16.vlgmr.msra.gmra.mrb[20].mxu1 %vm1348_vm2, %v1789_v39 }
 0x3d8   : > { %3451 = vmatpush3.bf16.xpose.msra.mxu1 %v1906_v40  ;;  %3452 = vmatprep.mubr.msk.bf16.mxu1 %vm4544_vm0, %v4543_v1 }
 0x3d9   : > { %3462 = vmatprep.subr.bf16.mxu1 %v4543_v1 }
 0x3df   : > { %3453 = vmatmul.mubr.msk.bf16.vlgmr.msra.gmra.mrb[24].mxu1 %vm1348_vm2, %v1899_v42 }
 0x3e0   : > { %3463 = vmatpush3.bf16.xpose.msra.mxu1 %v2016_v43  ;;  %3464 = vmatprep.mubr.msk.bf16.mxu1 %vm4544_vm0, %v4543_v1 }
 0x3e1   : > { %3474 = vmatprep.subr.bf16.mxu1 %v4543_v1 }
 0x3e7   : > { %3465 = vmatmul.mubr.msk.bf16.vlgmr.msra.gmra.mrb[28].mxu1 %vm1348_vm2, %v2009_v45 }
 0x3e8   : > { %3475 = vmatpush3.bf16.xpose.msra.mxu1 %v2126_v46  ;;  %3476 = vmatprep.mubr.msk.bf16.mxu1 %vm4544_vm0, %v4543_v1 }
 0x3e9   : > { %3486 = vmatprep.subr.bf16.mxu1 %v4543_v1 }
 0x3ef   : > { %3477 = vmatmul.mubr.msk.bf16.vlgmr.msra.gmra.mrb[32].mxu1 %vm1348_vm2, %v2119_v47 }
 0x3f0   : > { %3490 = vmatprep.mubr.msk.bf16.mxu1 %vm4544_vm0, %v4543_v1 }
 0x420   : > { %v1389_v55 = vpop.f32.mrb[4].mxu1 }
 0x421   : > { %v1390_v56 = vadd.f32 %v1389_v55, %v5354_v54  ;;  %v3394_v57 = vpop.f32.mrb[5].mxu1 }
 0x422   : > { %v1392_v58 = vpop.f32.mrb[6].mxu1 }
 0x423   : > { %v3395_v59 = vpop.f32.mrb[7].mxu1  ;;  %v1396_v60 = vsel %vm1395_vm4, %v1390_v56, -inf }
 0x424   : > { %1397 = vmax.xlane.f32.xlu0 %v1396_v60 }
 0x492   : > { %v1501_v6 = vpop.f32.mrb[8].mxu1 }
 0x493   : > { %v1502_v8 = vadd.f32 %v1501_v6, %v5354_v54  ;;  %v3406_v10 = vpop.f32.mrb[9].mxu1 }
 0x494   : > { %v1504_v11 = vpop.f32.mrb[10].mxu1 }
 0x495   : > { %v3407_v12 = vpop.f32.mrb[11].mxu1  ;;  %v1507_v13 = vsel %vm1395_vm4, %v1502_v8, -inf }
 0x496   : > { %1508 = vmax.xlane.f32.xlu1 %v1507_v13 }
 0x49a   : > { %v1612_v14 = vpop.f32.mrb[12].mxu1 }
 0x49b   : > { %v1613_v15 = vadd.f32 %v1612_v14, %v5354_v54  ;;  %v3418_v16 = vpop.f32.mrb[13].mxu1 }
 0x49c   : > { %v1615_v17 = vpop.f32.mrb[14].mxu1 }
 0x49d   : > { %v3419_v18 = vpop.f32.mrb[15].mxu1  ;;  %v1618_v19 = vsel %vm1395_vm4, %v1613_v15, -inf }
 0x49e   : > { %1619 = vmax.xlane.f32.xlu0 %v1618_v19 }
 0x4a2   : > { %v1722_v20 = vpop.f32.mrb[16].mxu1 }
 0x4a3   : > { %v1723_v21 = vadd.f32 %v1722_v20, %v5354_v54  ;;  %v3430_v22 = vpop.f32.mrb[17].mxu1 }
 0x4a4   : > { %v1725_v23 = vpop.f32.mrb[18].mxu1 }
 0x4a5   : > { %v3431_v24 = vpop.f32.mrb[19].mxu1  ;;  %v1728_v25 = vsel %vm1395_vm4, %v1723_v21, -inf }
 0x4a6   : > { %1729 = vmax.xlane.f32.xlu0 %v1728_v25 }
 0x4aa   : > { %v1832_v26 = vpop.f32.mrb[20].mxu1 }
 0x4ab   : > { %v5370_v27 = vadd.f32 %v1832_v26, %v5354_v54  ;;  %v3442_v28 = vpop.f32.mrb[21].mxu1 }
 0x4ac   : > { %v1835_v29 = vpop.f32.mrb[22].mxu1 }
 0x4ad   : > { %v3443_v30 = vpop.f32.mrb[23].mxu1  ;;  %v1838_v31 = vsel %vm1395_vm4, %v5370_v27, -inf }
 0x4ae   : > { %1839 = vmax.xlane.f32.xlu1 %v1838_v31 }
 0x4b1   : > { %v1398_v32 = vpop.xlane.xlu0 %1397 }
 0x4b2   : > { %v1399_v33 = vsub.f32 %v1390_v56, %v1398_v32  ;;  %v1942_v34 = vpop.f32.mrb[24].mxu1 }
 0x4b3   : > { %v5375_v35 = vadd.f32 %v1942_v34, %v5354_v54  ;;  %v3454_v36 = vpop.f32.mrb[25].mxu1 }
 0x4b4   : > { %v1400_v37 = vmul.f32 1.442695, %v1399_v33  ;;  %v1945_v38 = vpop.f32.mrb[26].mxu1 }
 0x4b5   : > { %v3455_v39 = vpop.f32.mrb[27].mxu1  ;;  %v1948_v40 = vsel %vm1395_vm4, %v5375_v35, -inf }
 0x4b6   : > { %3836 = vpow2.f32 %v1400_v37  ;;  %1949 = vmax.xlane.f32.xlu0 %v1948_v40 }
 0x4ba   : > { %v2052_v41 = vpop.f32.mrb[28].mxu1 }
 0x4bb   : > { %v5380_v42 = vadd.f32 %v2052_v41, %v5354_v54  ;;  %v3466_v43 = vpop.f32.mrb[29].mxu1 }
 0x4bc   : > { %v2055_v44 = vpop.f32.mrb[30].mxu1 }
 0x4bd   : > { %v3467_v45 = vpop.f32.mrb[31].mxu1  ;;  %v2058_v46 = vsel %vm1395_vm4, %v5380_v42, -inf }
 0x4be   : > { %2059 = vmax.xlane.f32.xlu1 %v2058_v46 }
 0x4c0   : > { %v3837_v47 = vpop.eup %3836 }
 0x4c1   : > { %v1402_v48 = vsel %vm1395_vm4, %v3837_v47, 0.0 }
 0x4c2   : > { %1403 = vadd.xlane.f32.xlu1 %v1402_v48  ;;  %v2162_v49 = vpop.f32.mrb[32].mxu1 }
 0x4c3   : > { %v2163_v50 = vadd.f32 %v2162_v49, %v5354_v54  ;;  %v3478_v51 = vpop.f32.mrb[33].mxu1 }
 0x4c4   : > { %v2165_v52 = vpop.f32.mrb[34].mxu1 }
 0x4c5   : > { %v3479_v53 = vpop.f32.mrb[35].mxu1  ;;  %v2168_v55 = vsel %vm1395_vm4, %v2163_v50, -inf }
 0x4c6   : > { %2169 = vmax.xlane.f32.xlu0 %v2168_v55 }
 0x4d3   : > { %1630 = vrot.lane.b32.xlu1 %v5358_v3, %s4545_s20  ;;  %s1131_s20 = scalar_select %p1130_p3, %s4726_s0, 1 }
 0x4d4   : > { %s4418_s0 = scalar_lea.vmem %s5594_s15, 16 }
 0x4d5   : > { %p4419_p5 = scmp.ne.s32.totalorder %s5594_s15, %s4418_s0 }
 0x4dc   : > { %1520 = vrot.lane.b32.xlu0 %v5358_v3, %s4546_s5  ;;  %s3221_s5 = sshll.u32 %s1131_s20, 3 }
 0x523   : > { %v1509_v56 = vpop.xlane.xlu1 %1508 }
 0x524   : > { %v1510_v57 = vsub.f32 %v1502_v8, %v1509_v56 }
 0x526   : > { %v1511_v58 = vmul.f32 1.442695, %v1510_v57 }
 0x528   : > { %3838 = vpow2.f32 %v1511_v58 }
 0x52b   : > { %v1620_v59 = vpop.xlane.xlu0 %1619 }
 0x52c   : > { %v1621_v60 = vsub.f32 %v1613_v15, %v1620_v59 }
 0x52e   : > { %v1622_v61 = vmul.f32 1.442695, %v1621_v60 }
 0x530   : > { %3840 = vpow2.f32 %v1622_v61 }
 0x532   : > { %v5391_v54 = vpop.eup %3838 }
 0x533   : > { %v1730_v62 = vpop.xlane.xlu0 %1729  ;;  %v1513_v63 = vsel %vm1395_vm4, %v5391_v54, 0.0 }
 0x534   : > { %v1731_v0 = vsub.f32 %v1723_v21, %v1730_v62  ;;  %1514 = vadd.xlane.f32.xlu0 %v1513_v63 }
 0x536   : > { %v1732_v2 = vmul.f32 1.442695, %v1731_v0 }
 0x538   : > { %3842 = vpow2.f32 %v1732_v2 }
 0x53a   : > { %v5395_v4 = vpop.eup %3840 }
 0x53b   : > { %v1624_v5 = vsel %vm1395_vm4, %v5395_v4, 0.0  ;;  %v1840_v10 = vpop.xlane.xlu1 %1839 }
 0x53c   : > { %1625 = vadd.xlane.f32.xlu1 %v1624_v5  ;;  %v1841_v16 = vsub.f32 %v5370_v27, %v1840_v10 }
 0x53e   : > { %v1842_v21 = vmul.f32 1.442695, %v1841_v16 }
 0x542   : > { %v5399_v6 = vpop.eup %3842 }
 0x543   : > { %v1734_v8 = vsel %vm1395_vm4, %v5399_v6, 0.0  ;;  %v1950_v13 = vpop.xlane.xlu0 %1949 }
 0x544   : > { %1735 = vadd.xlane.f32.xlu0 %v1734_v8  ;;  %v1951_v22 = vsub.f32 %v5375_v35, %v1950_v13 }
 0x546   : > { %v1952_v24 = vmul.f32 1.442695, %v1951_v22 }
 0x54b   : > { %v2060_v11 = vpop.xlane.xlu1 %2059 }
 0x54c   : > { %v2061_v23 = vsub.f32 %v5380_v42, %v2060_v11 }
 0x54d   : > { %1740 = vrot.lane.b32.xlu1 %v5358_v3, %s4547_s29 }
 0x54e   : > { %v2062_v26 = vmul.f32 1.442695, %v2061_v23 }
 0x54f   : > { %v1404_v12 = vpop.xlane.xlu1 %1403 }
 0x550   : > { %3844 = vrcp.f32 %v1404_v12 }
 0x551   : > { %3846 = vpow2.f32 %v1842_v21 }
 0x552   : > { %3848 = vpow2.f32 %v1952_v24 }
 0x553   : > { %v2170_v14 = vpop.xlane.xlu0 %2169  ;;  %3850 = vpow2.f32 %v2062_v26  ;;  %v1631_v37 = vpop.permute.xlu1 %1630 }
 0x554   : > { %v2171_v25 = vsub.f32 %v2163_v50, %v2170_v14  ;;  %v1636_v42 = vsel %vm1411_vm5, %v1631_v37, 0 }
 0x556   : > { %v2172_v27 = vmul.f32 1.442695, %v2171_v25 }
 0x557   : > { %v1521_v17 = vpop.permute.xlu0 %1520 }
 0x558   : > { %v1526_v20 = vsel %vm1411_vm5, %v1521_v17, 0  ;;  %3852 = vpow2.f32 %v2172_v27 }
 0x55a   : > { %1850 = vrot.lane.b32.xlu0 %v5358_v3, %s4548_s24  ;;  %v3845_v15 = vpop.eup %3844  ;;  %s2896_s24 = scalar_lea.sflag [#allocation5], %s5215_s7 }
 0x55b   : > { %v1406_v18 = vmul.f32 %v3845_v15, %v3837_v47  ;;  %v3847_v28 = vpop.eup %3846 }
 0x55c   : > { %v1844_v29 = vsel %vm1395_vm4, %v3847_v28, 0.0  ;;  %v3849_v30 = vpop.eup %3848 }
 0x55d   : > { %v1407_v19 = vpack.c.bf16 %v1406_v18, %v1406_v18  ;;  %v5416_v31 = vpop.eup %3850  ;;  %v1954_v32 = vsel %vm1395_vm4, %v3849_v30, 0.0 }
 0x55e   : > { %v2064_v35 = vsel %vm1395_vm4, %v5416_v31, 0.0 }
 0x55f   : > { %3399 = vmatmul.mubr.msk.bf16.vlgmr.msra.gmra.mrb[8].mxu0 %vm1395_vm4, %v1407_v19 }
 0x560   : > { %3409 = vmatpush3.bf16.msra.mxu0 %v1526_v20  ;;  %3410 = vmatprep.mubr.msk.bf16.mxu0 %vm4544_vm0, %v4543_v1 }
 0x561   : > { %3420 = vmatprep.subr.bf16.mxu0 %v4543_v1 }
 0x562   : > { %v5419_v33 = vpop.eup %3852 }
 0x563   : > { %v2174_v34 = vsel %vm1395_vm4, %v5419_v33, 0.0 }
 0x571   : > { %1845 = vadd.xlane.f32.xlu1 %v1844_v29 }
 0x575   : > { %1955 = vadd.xlane.f32.xlu1 %v1954_v32 }
 0x579   : > { %2175 = vadd.xlane.f32.xlu1 %v2174_v34  ;;  %2065 = vadd.xlane.f32.xlu0 %v2064_v35  ;;  %v3810_v35 = vld [vmem:[#allocation17] sm:$0xff]  }
 0x57a   : > { %3487 = vmatpush3.bf16.msra.mxu1 %v3810_v35 }
 0x57b   : > { %3488 = vmatprep.subr.bf16.mxu1 %v4543_v1 }
 0x58a   : > { %1960 = vrot.lane.b32.xlu1 %v5358_v3, %s4549_s25  ;;  %s5796_s25 = sld [smem:[#allocation54_spill]] }
 0x58f   : > { %2070 = vrot.lane.b32.xlu0 %v5358_v3, %s4550_s8 }
 0x590   : > { %s1133_s8 = scalar_lea.vmem %s5796_s25, %s3221_s5  ;;  %s5802_s5 = sld [smem:[#allocation74_spill]] }
 0x591   : > { %s4561_s25 = smov [#allocation33]  }
 0x593   : > { %2180 = vrot.lane.b32.xlu0 %v5358_v3, %s4551_s3 }
 0x596   : > { %s5592_s29 = scalar_lea.hbm %s5802_s5, %s3289_s13 }
 0x5c1   : > { %v1515_v36 = vpop.xlane.xlu0 %1514 }
 0x5c2   : > { %3854 = vrcp.f32 %v1515_v36 }
 0x5c9   : > { %v1626_v38 = vpop.xlane.xlu1 %1625 }
 0x5ca   : > { %3856 = vrcp.f32 %v1626_v38 }
 0x5cc   : > { %v3855_v39 = vpop.eup %3854 }
 0x5cd   : > { %v1517_v40 = vmul.f32 %v3855_v39, %v5391_v54  ;;  %v1741_v45 = vpop.permute.xlu1 %1740 }
 0x5ce   : > { %v1746_v47 = vsel %vm1411_vm5, %v1741_v45, 0 }
 0x5cf   : > { %v1518_v41 = vpack.c.bf16 %v1517_v40, %v1517_v40  ;;  %v3811_v40 = vld [vmem:[#allocation17 + $0x8] sm:$0xff]  }
 0x5d0   : > { %3489 = vmatpush3.bf16.msra.mxu1 %v3811_v40 }
 0x5d1   : > { %v1736_v43 = vpop.xlane.xlu0 %1735  ;;  %3411 = vmatmul.mubr.msk.bf16.vlgmr.msra.gmra.mrb[12].mxu0 %vm1395_vm4, %v1518_v41  ;;  %3502 = vmatprep.subr.bf16.mxu1 %v4543_v1 }
 0x5d2   : > { %3858 = vrcp.f32 %v1736_v43  ;;  %3421 = vmatpush3.bf16.msra.mxu0 %v1636_v42  ;;  %3422 = vmatprep.mubr.msk.bf16.mxu0 %vm4544_vm0, %v4543_v1  ;;  %v3813_v42 = vld [vmem:[#allocation21] sm:$0xff]  }
 0x5d3   : > { %3432 = vmatprep.subr.bf16.mxu0 %v4543_v1 }
 0x5d4   : > { %v3857_v3 = vpop.eup %3856 }
 0x5d5   : > { %v1628_v44 = vmul.f32 %v3857_v3, %v5395_v4  ;;  %v1851_v50 = vpop.permute.xlu0 %1850 }
 0x5d6   : > { %v1856_v52 = vsel %vm1411_vm5, %v1851_v50, 0 }
 0x5d7   : > { %v1629_v46 = vpack.c.bf16 %v1628_v44, %v1628_v44 }
 0x5d9   : > { %3423 = vmatmul.mubr.msk.bf16.vlgmr.msra.gmra.mrb[16].mxu0 %vm1395_vm4, %v1629_v46 }
 0x5da   : > { %3433 = vmatpush3.bf16.msra.mxu0 %v1746_v47  ;;  %3434 = vmatprep.mubr.msk.bf16.mxu0 %vm4544_vm0, %v4543_v1 }
 0x5db   : > { %3444 = vmatprep.subr.bf16.mxu0 %v4543_v1 }
 0x5dc   : > { %v3859_v48 = vpop.eup %3858 }
 0x5dd   : > { %v1738_v49 = vmul.f32 %v3859_v48, %v5399_v6 }
 0x5df   : > { %v1739_v51 = vpack.c.bf16 %v1738_v49, %v1738_v49 }
 0x5e1   : > { %3435 = vmatmul.mubr.msk.bf16.vlgmr.msra.gmra.mrb[20].mxu0 %vm1395_vm4, %v1739_v51 }
 0x5e2   : > { %3445 = vmatpush3.bf16.msra.mxu0 %v1856_v52  ;;  %3446 = vmatprep.mubr.msk.bf16.mxu0 %vm4544_vm0, %v4543_v1 }
 0x5e3   : > { %3456 = vmatprep.subr.bf16.mxu0 %v4543_v1 }
 0x5fe   : > { %v1846_v53 = vpop.xlane.xlu1 %1845 }
 0x5ff   : > { %3860 = vrcp.f32 %v1846_v53 }
 0x602   : > { %v1956_v55 = vpop.xlane.xlu1 %1955 }
 0x603   : > { %3862 = vrcp.f32 %v1956_v55 }
 0x606   : > { %v2176_v56 = vpop.xlane.xlu1 %2175  ;;  %v2066_v57 = vpop.xlane.xlu0 %2065 }
 0x607   : > { %3864 = vrcp.f32 %v2066_v57 }
 0x608   : > { %3866 = vrcp.f32 %v2176_v56 }
 0x609   : > { %v3861_v58 = vpop.eup %3860 }
 0x60a   : > { %v1848_v59 = vmul.f32 %v3861_v58, %v3847_v28  ;;  %v1961_v60 = vpop.permute.xlu1 %1960  ;;  %v2071_v0 = vpop.permute.xlu0 %2070 }
 0x60b   : > { %v1966_v62 = vsel %vm1411_vm5, %v1961_v60, 0  ;;  %v2076_v5 = vsel %vm1411_vm5, %v2071_v0, 0 }
 0x60c   : > { %v1849_v61 = vpack.c.bf16 %v1848_v59, %v1848_v59 }
 0x60d   : > { %v3863_v54 = vpop.eup %3862 }
 0x60e   : > { %3447 = vmatmul.mubr.msk.bf16.vlgmr.msra.gmra.mrb[24].mxu0 %vm1395_vm4, %v1849_v61  ;;  %v1958_v63 = vmul.f32 %v3863_v54, %v3849_v30  ;;  %v2181_v8 = vpop.permute.xlu0 %2180 }
 0x60f   : > { %3457 = vmatpush3.bf16.msra.mxu0 %v1966_v62  ;;  %3458 = vmatprep.mubr.msk.bf16.mxu0 %vm4544_vm0, %v4543_v1  ;;  %v2186_v12 = vsel %vm1411_vm5, %v2181_v8, 0 }
 0x610   : > { %3468 = vmatprep.subr.bf16.mxu0 %v4543_v1  ;;  %v1959_v2 = vpack.c.bf16 %v1958_v63, %v1958_v63  ;;  %v3812_v63 = vld [vmem:[#allocation20] sm:$0xff]  }
 0x611   : > { %v3865_v4 = vpop.eup %3864 }
 0x612   : > { %v2068_v6 = vmul.f32 %v3865_v4, %v5416_v31  ;;  %v3867_v11 = vpop.eup %3866  ;;  %v3815_v4 = vld [vmem:[#allocation21 + $0x8] sm:$0xff]  }
 0x613   : > { %v2178_v13 = vmul.f32 %v3867_v11, %v5419_v33 }
 0x614   : > { %v2069_v10 = vpack.c.bf16 %v2068_v6, %v2068_v6 }
 0x615   : > { %v2179_v14 = vpack.c.bf16 %v2178_v13, %v2178_v13 }
 0x616   : > { %3459 = vmatmul.mubr.msk.bf16.vlgmr.msra.gmra.mrb[28].mxu0 %vm1395_vm4, %v1959_v2  ;;  %v3814_v2 = vld [vmem:[#allocation20 + $0x8] sm:$0xff]  }
 0x617   : > { %3469 = vmatpush3.bf16.msra.mxu0 %v2076_v5  ;;  %3470 = vmatprep.mubr.msk.bf16.mxu0 %vm4544_vm0, %v4543_v1  ;;  %v3250_v5 = vld [vmem:[#allocation18] ss:$0 sm:$0xff] }
 0x618   : > { %3480 = vmatprep.subr.bf16.mxu0 %v4543_v1 }
 0x61e   : > { %3471 = vmatmul.mubr.msk.bf16.vlgmr.msra.gmra.mrb[32].mxu0 %vm1395_vm4, %v2069_v10 }
 0x61f   : > { %3481 = vmatpush3.bf16.msra.mxu0 %v2186_v12  ;;  %3482 = vmatprep.mubr.msk.bf16.mxu0 %vm4544_vm0, %v4543_v1 }
 0x620   : > { %3494 = vmatprep.subr.bf16.mxu0 %v4543_v1 }
 0x626   : > { %3483 = vmatmul.mubr.msk.bf16.vlgmr.msra.gmra.mrb[36].mxu0 %vm1395_vm4, %v2179_v14 }
 0x627   : > { %3498 = vmatprep.mubr.msk.bf16.mxu0 %vm4544_vm0, %v4543_v1  ;;  %3495 = vmatpush3.bf16.msra.mxu0 %v3813_v42 }
 0x628   : > { %3496 = vmatprep.subr.bf16.mxu0 %v4543_v1 }
 0x62b   : > { %3497 = vmatpush3.bf16.msra.mxu0 %v3815_v4 }
 0x62c   : > { %3510 = vmatprep.subr.bf16.mxu0 %v4543_v1 }
 0x632   : > { %v1449_v15 = vpop.f32.mrb[8].mxu0 }
 0x633   : > { %v3400_v16 = vpop.f32.mrb[9].mxu0 }
 0x634   : > { %v1452_v17 = vpop.f32.mrb[10].mxu0 }
 0x635   : > { %v3401_v18 = vpop.f32.mrb[11].mxu0 }
 0x636   : > { %v3260_v18 = vld [vmem:[#allocation23] ss:$0 sm:$0xff] }
 0x6a4   : > { %v1562_v19 = vpop.f32.mrb[12].mxu0 }
 0x6a5   : > { %2229 = vrot.lane.b32.xlu1 %v1562_v19, %s4553_s17  ;;  %v3412_v20 = vpop.f32.mrb[13].mxu0  ;;  %s5798_s17 = sld [smem:[#allocation72_spill]] }
 0x6a6   : > { %v1565_v21 = vpop.f32.mrb[14].mxu0 }
 0x6a7   : > { %v3413_v22 = vpop.f32.mrb[15].mxu0 }
 0x6ac   : > { %v1672_v23 = vpop.f32.mrb[16].mxu0 }
 0x6ad   : > { %2233 = vrot.lane.b32.xlu0 %v1672_v23, %s4554_s4  ;;  %v3424_v24 = vpop.f32.mrb[17].mxu0  ;;  %s5797_s4 = sld [smem:[#allocation70_spill]] }
 0x6ae   : > { %v1675_v25 = vpop.f32.mrb[18].mxu0 }
 0x6af   : > { %v3425_v26 = vpop.f32.mrb[19].mxu0 }
 0x6b4   : > { %v1782_v27 = vpop.f32.mrb[20].mxu0 }
 0x6b5   : > { %2237 = vrot.lane.b32.xlu1 %v1782_v27, %s4555_s28  ;;  %v3436_v28 = vpop.f32.mrb[21].mxu0  ;;  %s5799_s28 = sld [smem:[#allocation71_spill]] }
 0x6b6   : > { %v1785_v29 = vpop.f32.mrb[22].mxu0 }
 0x6b7   : > { %v3437_v30 = vpop.f32.mrb[23].mxu0 }
 0x6e1   : > { %v1892_v31 = vpop.f32.mrb[24].mxu0 }
 0x6e2   : > { %2241 = vrot.lane.b32.xlu0 %v1892_v31, %s4556_s6  ;;  %v3448_v32 = vpop.f32.mrb[25].mxu0 }
 0x6e3   : > { %v1895_v33 = vpop.f32.mrb[26].mxu0 }
 0x6e4   : > { %v3449_v34 = vpop.f32.mrb[27].mxu0 }
 0x6e9   : > { %v2002_v36 = vpop.f32.mrb[28].mxu0 }
 0x6ea   : > { %2245 = vrot.lane.b32.xlu1 %v2002_v36, %s4557_s10  ;;  %v3460_v37 = vpop.f32.mrb[29].mxu0  ;;  %v3816_v36 = vld [vmem:[%s5795_s23] sm:$0xff]  }
 0x6eb   : > { %v2005_v38 = vpop.f32.mrb[30].mxu0  ;;  %v3817_v37 = vld [vmem:[%s5795_s23 + $0x8] sm:$0xff]  }
 0x6ec   : > { %v3461_v39 = vpop.f32.mrb[31].mxu0 }
 0x6f1   : > { %v2112_v41 = vpop.f32.mrb[32].mxu0 }
 0x6f2   : > { %2249 = vrot.lane.b32.xlu0 %v2112_v41, %s4558_s22  ;;  %v3472_v43 = vpop.f32.mrb[33].mxu0  ;;  %v3262_v41 = vld [vmem:[#allocation24] ss:$0 sm:$0xff]  ;;  %s5800_s22 = sld [smem:[#allocation73_spill]] }
 0x6f3   : > { %v2115_v3 = vpop.f32.mrb[34].mxu0  ;;  %v3263_v43 = vld [vmem:[#allocation26] ss:$0 sm:$0xff] }
 0x6f4   : > { %v3473_v44 = vpop.f32.mrb[35].mxu0 }
 0x6f9   : > { %v2222_v45 = vpop.f32.mrb[36].mxu0 }
 0x6fa   : > { %2253 = vrot.lane.b32.xlu1 %v2222_v45, %s4559_s11  ;;  %v3484_v46 = vpop.f32.mrb[37].mxu0  ;;  %s5801_s11 = sld [smem:[#allocation50_spill]] }
 0x6fb   : > { %v2225_v47 = vpop.f32.mrb[38].mxu0  ;;  %v3264_v46 = vld [vmem:[#allocation27] ss:$0 sm:$0xff] }
 0x6fc   : > { %v3485_v48 = vpop.f32.mrb[39].mxu0 }
 0x700   : > { %p5803_p9 = scmp.ne.s32.totalorder %s5801_s11, 0 }
 0x702   : > { %p4420_p6 = pnand %p4419_p5, %p5803_p9 }
 0x704   : > { %p4421_p1 = pneg %p4420_p6 }
 0x717   : > { %v2230_v49 = vpop.permute.xlu1 %2229 }
 0x718   : > { %v2256_v53 = vsel %vm1348_vm2, %v1449_v15, %v2230_v49 }
 0x71f   : > { %v2234_v50 = vpop.permute.xlu0 %2233 }
 0x720   : > { %v2257_v55 = vsel %vm1395_vm4, %v2256_v53, %v2234_v50 }
 0x727   : > { %v2238_v51 = vpop.permute.xlu1 %2237 }
 0x728   : > { %v2259_v57 = vsel %vm2258_vm6, %v2257_v55, %v2238_v51 }
 0x754   : > { %v2242_v52 = vpop.permute.xlu0 %2241 }
 0x755   : > { %v2261_v59 = vsel %vm2260_vm7, %v2259_v57, %v2242_v52  ;;  %v3268_v52 = vld [vmem:[#allocation29] ss:$0 sm:$0xff]  ;;  %v4560_v57 = vmov 0  }
 0x756   : > { %3803 = vset.pattern.permute.xlu0 %v4560_v57 }
 0x75c   : > { %v2246_v56 = vpop.permute.xlu1 %2245 }
 0x75d   : > { %v2263_v60 = vsel %vm2262_vm8, %v2261_v59, %v2246_v56  ;;  %v3269_v59 = vld [vmem:[#allocation2] ss:$0 sm:$0xff] }
 0x764   : > { %v2250_v58 = vpop.permute.xlu0 %2249 }
 0x765   : > { %v2265_v61 = vsel %vm2264_vm9, %v2263_v60, %v2250_v58  ;;  %v1137_v58 = vld [vmem:[%s1133_s8] sm:$0xff]  ;;  %s4422_s8 = sshll.u32 %s4561_s25, 4  ;;  %s4423_s8 = int_to_ptr.vmem [resolvable:$false] %s4422_s8 }
 0x766   : > { %vm2584_vm11 = vcmp.eq.f32.partialorder %v1137_v58, 0.0  ;;  %s4424_s3 = scalar_lea.vmem %s4423_s8, 32  ;;  %p4425_p7 = scmp.lt.s32.totalorder %s5594_s15, %s4423_s8 }
 0x767   : > { %p4426_p11 = scmp.lt.s32.totalorder %s4424_s3, %s4418_s0 }
 0x769   : > { %p4427_p12 = por %p4426_p11, %p4425_p7 }
 0x76b   : > { %p4428_p4 = pnand %p4427_p12, %p4421_p1 }
 0x76c   : > { %v2254_v54 = vpop.permute.xlu1 %2253 }
 0x76d   : > { %v2267_v62 = vsel %vm2266_vm10, %v2265_v61, %v2254_v54 }
 0x76e   : > { %v2268_v0 = vpack.c.bf16 %v2267_v62, %v2267_v62 }
 0x770   : > { %3491 = vmatmul.mubr.msk.bf16.vlgmr.msra.gmra.mrb[36].mxu1 %vm1164_vm1, %v2268_v0 }
 0x771   : > { %3503 = vmatpush3.bf16.msra.mxu1 %v3812_v63  ;;  %3506 = vmatprep.mubr.msk.bf16.mxu1 %vm4544_vm0, %v4543_v1 }
 0x772   : > { %3504 = vmatprep.subr.bf16.mxu1 %v4543_v1 }
 0x775   : > { %3505 = vmatpush3.bf16.msra.mxu1 %v3814_v2 }
 0x776   : > { %3518 = vmatprep.subr.bf16.mxu1 %v4543_v1 }
 0x778   : > { %3507 = vmatmul.mubr.msk.bf16.vlgmr.msra.gmra.mrb[40].mxu1 %vm1164_vm1, %v5279_v9 }
 0x779   : > { %3522 = vmatprep.mubr.msk.bf16.mxu1 %vm4544_vm0, %v4543_v1 }
 0x843   : > { %v2329_v6 = vpop.f32.mrb[36].mxu1 }
 0x844   : > { %v2330_v8 = vadd.f32 %v3250_v5, %v2329_v6  ;;  %v3492_v10 = vpop.f32.mrb[37].mxu1 }
 0x845   : > { %v2332_v11 = vpop.f32.mrb[38].mxu1 }
 0x846   : > { %v2335_v12 = vpack.c.bf16 %v2330_v8, %v2330_v8  ;;  %v3493_v13 = vpop.f32.mrb[39].mxu1 }
 0x848   : > { %3499 = vmatmul.mubr.msk.bf16.vlgmr.msra.gmra.mrb[40].mxu0 %vm1164_vm1, %v2335_v12 }
 0x849   : > { %3514 = vmatprep.mubr.msk.bf16.mxu0 %vm4544_vm0, %v4543_v1  ;;  %3511 = vmatpush3.bf16.msra.mxu0 %v3816_v36 }
 0x84a   : > { %3512 = vmatprep.subr.bf16.mxu0 %v4543_v1 }
 0x84b   : > { %v2445_v14 = vpop.f32.mrb[40].mxu1 }
 0x84c   : > { %v3508_v15 = vpop.f32.mrb[41].mxu1 }
 0x84d   : > { %v2448_v9 = vpop.f32.mrb[42].mxu1  ;;  %3513 = vmatpush3.bf16.msra.mxu0 %v3817_v37 }
 0x84e   : > { %v3509_v16 = vpop.f32.mrb[43].mxu1  ;;  %3526 = vmatprep.subr.bf16.mxu0 %v4543_v1 }
 0x91b   : > { %v2393_v17 = vpop.f32.mrb[40].mxu0 }
 0x91c   : > { %v2446_v19 = vadd.f32 %v2445_v14, %v2393_v17  ;;  %v3500_v20 = vpop.f32.mrb[41].mxu0 }
 0x91d   : > { %v2396_v21 = vpop.f32.mrb[42].mxu0  ;;  %v3818_v20 = vld [vmem:[#allocation30] sm:$0xff]  }
 0x91e   : > { %v2458_v22 = vadd.f32 %v3260_v18, %v2446_v19  ;;  %v3501_v23 = vpop.f32.mrb[43].mxu0  ;;  %3519 = vmatpush3.bf16.msra.mxu1 %v3818_v20  ;;  %v3819_v21 = vld [vmem:[#allocation30 + $0x8] sm:$0xff]  }
 0x91f   : > { %3520 = vmatprep.subr.bf16.mxu1 %v4543_v1  ;;  %v3821_v23 = vld [vmem:[%s5797_s4 + $0x8] sm:$0xff]  }
 0x920   : > { %v3261_v24 = vmul.f32 -1.442695, %v2458_v22  ;;  %v3820_v22 = vld [vmem:[%s5797_s4] sm:$0xff]  }
 0x922   : > { %3868 = vpow2.f32 %v3261_v24  ;;  %3521 = vmatpush3.bf16.msra.mxu1 %v3819_v21  ;;  %v3822_v24 = vld [vmem:[%s5797_s4 + $0x10] sm:$0xff]  }
 0x923   : > { %3546 = vmatprep.subr.bf16.mxu1 %v4543_v1 }
 0x92c   : > { %v3869_v25 = vpop.eup %3868 }
 0x92d   : > { %v2462_v26 = vadd.f32 1.0, %v3869_v25  ;;  %v3823_v25 = vld [vmem:[%s5797_s4 + $0x18] sm:$0xff]  }
 0x92f   : > { %3870 = vrcp.f32 %v2462_v26  ;;  %v3824_v26 = vld [vmem:[%s5797_s4 + $0x20] sm:$0xff]  }
 0x939   : > { %v3871_v27 = vpop.eup %3870 }
 0x93a   : > { %v2465_v28 = vmul.f32 %v3871_v27, %v2330_v8  ;;  %v3825_v27 = vld [vmem:[%s5797_s4 + $0x28] sm:$0xff]  }
 0x93c   : > { %v2466_v29 = vadd.f32 %v2465_v28, %v5275_v7 }
 0x93e   : > { %v2467_v30 = vsel %vm1164_vm1, %v2466_v29, 0.0 }
 0x93f   : > { %2468 = vadd.xlane.f32.xlu0 %v2467_v30 }
 0x9cc   : > { %v2469_v31 = vpop.xlane.xlu0 %2468 }
 0x9cd   : > { %v2471_v32 = vmul.f32 0.03125, %v2469_v31 }
 0x9cf   : > { %v2472_v33 = vsub.f32 %v2466_v29, %v2471_v32 }
 0x9d1   : > { %v2473_v34 = vmul.f32 %v2472_v33, %v2472_v33 }
 0x9d3   : > { %v2474_v35 = vsel %vm1164_vm1, %v2473_v34, 0.0 }
 0x9d4   : > { %2475 = vadd.xlane.f32.xlu1 %v2474_v35 }
 0xa61   : > { %v2476_v7 = vpop.xlane.xlu1 %2475 }
 0xa62   : > { %v2477_v38 = vmul.f32 0.03125, %v2476_v7  ;;  %v3826_v7 = vld [vmem:[%s5797_s4 + $0x30] sm:$0xff]  }
 0xa64   : > { %v2478_v39 = vadd.f32 1e-05, %v2477_v38  ;;  %v3827_v38 = vld [vmem:[%s5797_s4 + $0x38] sm:$0xff]  }
 0xa66   : > { %3872 = vrsqrt.f32 %v2478_v39  ;;  %v3828_v39 = vld [vmem:[%s5798_s17] sm:$0xff]  }
 0xa70   : > { %v3873_v40 = vpop.eup %3872 }
 0xa71   : > { %v2480_v42 = vmul.f32 %v3873_v40, %v2472_v33  ;;  %v3829_v40 = vld [vmem:[%s5798_s17 + $0x8] sm:$0xff]  }
 0xa73   : > { %v2488_v3 = vmul.f32 %v3262_v41, %v2480_v42  ;;  %v3830_v41 = vld [vmem:[%s5798_s17 + $0x10] sm:$0xff]   ;;  %v3831_v42 = vld [vmem:[%s5798_s17 + $0x18] sm:$0xff]  }
 0xa75   : > { %v5499_v44 = vadd.f32 %v3263_v43, %v2488_v3  ;;  %v3832_v43 = vld [vmem:[%s5798_s17 + $0x20] sm:$0xff]   ;;  %v3833_v3 = vld [vmem:[%s5798_s17 + $0x28] sm:$0xff]  }
 0xa77   : > { %v2497_v45 = vpack.c.bf16 %v5499_v44, %v5499_v44 }
 0xa79   : > { %3515 = vmatmul.mubr.msk.bf16.vlgmr.msra.gmra.mrb[44].mxu0 %vm1164_vm1, %v2497_v45 }
 0xa7a   : > { %3542 = vmatprep.mubr.msk.bf16.mxu0 %vm4544_vm0, %v4543_v1  ;;  %3527 = vmatpush3.bf16.msra.mxu0 %v3820_v22 }
 0xa7b   : > { %3528 = vmatprep.subr.bf16.mxu0 %v4543_v1 }
 0xa7e   : > { %3529 = vmatpush3.bf16.msra.mxu0 %v3821_v23 }
 0xa7f   : > { %3530 = vmatprep.subr.bf16.mxu0 %v4543_v1 }
 0xa82   : > { %3531 = vmatpush3.bf16.msra.mxu0 %v3822_v24 }
 0xa83   : > { %3532 = vmatprep.subr.bf16.mxu0 %v4543_v1 }
 0xa86   : > { %3533 = vmatpush3.bf16.msra.mxu0 %v3823_v25 }
 0xa87   : > { %3534 = vmatprep.subr.bf16.mxu0 %v4543_v1 }
 0xa8a   : > { %3535 = vmatpush3.bf16.msra.mxu0 %v3824_v26 }
 0xa8b   : > { %3536 = vmatprep.subr.bf16.mxu0 %v4543_v1 }
 0xa8e   : > { %3537 = vmatpush3.bf16.msra.mxu0 %v3825_v27 }
 0xa8f   : > { %3538 = vmatprep.subr.bf16.mxu0 %v4543_v1 }
 0xa92   : > { %3539 = vmatpush3.bf16.msra.mxu0 %v3826_v7 }
 0xa93   : > { %3540 = vmatprep.subr.bf16.mxu0 %v4543_v1 }
 0xa96   : > { %3541 = vmatpush3.bf16.msra.mxu0 %v3827_v38 }
 0xb4c   : > { %v2558_v47 = vpop.f32.mrb[44].mxu0 }
 0xb4d   : > { %v2559_v48 = vadd.f32 %v3264_v46, %v2558_v47  ;;  %v3516_v49 = vpop.f32.mrb[45].mxu0 }
 0xb4e   : > { %v2561_v50 = vpop.f32.mrb[46].mxu0 }
 0xb4f   : > { %3874 = vtanh.f32 %v2559_v48  ;;  %v3517_v51 = vpop.f32.mrb[47].mxu0 }
 0xb59   : > { %v3875_v53 = vpop.eup %3874 }
 0xb5a   : > { %v2572_v55 = vmul.f32 %v3875_v53, %v3268_v52  ;;  %v3834_v52 = vld [vmem:[%s5798_s17 + $0x30] sm:$0xff]   ;;  %v3835_v53 = vld [vmem:[%s5798_s17 + $0x38] sm:$0xff]  }
 0xb5c   : > { %v2573_v56 = vsel %vm2260_vm7, %v2572_v55, 0.0  ;;  %v2698_v55 = vld [vmem:[%s5799_s28] sm:$0x1] }
 0xb5d   : > { %2574 = vadd.xlane.f32.xlu0 %v2573_v56 }
 0xbea   : > { %v2575_v60 = vpop.xlane.xlu0 %2574 }
 0xbeb   : > { %v2583_v61 = vadd.f32 %v3269_v59, %v2575_v60 }
 0xbed   : > { %v2585_v54 = vsel %vm2584_vm11, -1e+09, %v2583_v61 }
 0xbee   : > { %v2587_v62 = vsel %vm2586_vm12, %v2585_v54, -inf }
 0xbef   : > { %v2588_v63 = vrot.slane %v2587_v62, 4 }
 0xbf1   : > { %v2589_v0 = vmax.f32 %v2587_v62, %v2588_v63 }
 0xbf3   : > { %v2590_v2 = vrot.slane %v2589_v0, 2 }
 0xbf5   : > { %v2591_v4 = vmax.f32 %v2589_v0, %v2590_v2 }
 0xbf7   : > { %v2592_v5 = vrot.slane %v2591_v4, 1 }
 0xbf9   : > { %v2593_v6 = vmax.f32 %v2591_v4, %v2592_v5 }
 0xbfb   : > { %v2594_v8 = vsub.f32 %v2585_v54, %v2593_v6 }
 0xbfd   : > { %v2595_v10 = vmul.f32 1.442695, %v2594_v8 }
 0xbff   : > { %3876 = vpow2.f32 %v2595_v10 }
 0xc09   : > { %v3877_v11 = vpop.eup %3876 }
 0xc0a   : > { %v2597_v12 = vsel %vm2586_vm12, %v3877_v11, 0.0 }
 0xc0b   : > { %v2598_v13 = vrot.slane %v2597_v12, 4 }
 0xc0d   : > { %v2599_v14 = vadd.f32 %v2598_v13, %v2597_v12 }
 0xc0f   : > { %v2600_v15 = vrot.slane %v2599_v14, 2 }
 0xc11   : > { %v2601_v9 = vadd.f32 %v2600_v15, %v2599_v14 }
 0xc13   : > { %v2602_v16 = vrot.slane %v2601_v9, 1 }
 0xc15   : > { %v2603_v17 = vadd.f32 %v2602_v16, %v2601_v9 }
 0xc17   : > { %3878 = vrcp.f32 %v2603_v17 }
 0xc21   : > { %v3879_v18 = vpop.eup %3878 }
 0xc22   : > { %v2605_v19 = vmul.f32 %v3879_v18, %v3877_v11 }
 0xc24   : > { %2608 = vperm.xlu0 %3803, %v2605_v19  }
 0xca3   : > { %v2609_v28 = vpop.permute.xlu0 %2608 }
 0xca4   : > { %v2611_v29 = vmul.f32 %v2609_v28, %v5499_v44  ;;  %v2624_v44 = vld [vmem:[#allocation32] sm:$0x1] }
 0xca6   : > { %v2612_v30 = vsel %vm1164_vm1, %v2611_v29, 0.0 }
 0xca7   : > { %v2613_v31 = vrot.slane %v2612_v30, 4 }
 0xca9   : > { %v2614_v32 = vadd.f32 %v2613_v31, %v2612_v30 }
 0xcab   : > { %v2615_v33 = vrot.slane %v2614_v32, 2 }
 0xcad   : > { %v2616_v34 = vadd.f32 %v2615_v33, %v2614_v32 }
 0xcaf   : > { %v2617_v35 = vrot.slane %v2616_v34, 1 }
 0xcb1   : > { %v2618_v36 = vadd.f32 %v2617_v35, %v2616_v34 }
 0xcb3   : > { %v2619_v37 = vpack.c.bf16 %v2618_v36, %v2618_v36 }
 0xcb5   : > { %3523 = vmatmul.mubr.msk.bf16.vlgmr.msra.gmra.mrb[44].mxu1 %vm1164_vm1, %v2619_v37 }
 0xcb6   : > { %3562 = vmatprep.mubr.msk.bf16.mxu1 %vm4544_vm0, %v4543_v1  ;;  %3547 = vmatpush3.bf16.msra.mxu1 %v3828_v39 }
 0xcb7   : > { %3548 = vmatprep.subr.bf16.mxu1 %v4543_v1 }
 0xcba   : > { %3549 = vmatpush3.bf16.msra.mxu1 %v3829_v40 }
 0xcbb   : > { %3550 = vmatprep.subr.bf16.mxu1 %v4543_v1 }
 0xcbe   : > { %3551 = vmatpush3.bf16.msra.mxu1 %v3830_v41 }
 0xcbf   : > { %3552 = vmatprep.subr.bf16.mxu1 %v4543_v1 }
 0xcc2   : > { %3553 = vmatpush3.bf16.msra.mxu1 %v3831_v42 }
 0xcc3   : > { %3554 = vmatprep.subr.bf16.mxu1 %v4543_v1 }
 0xcc6   : > { %3555 = vmatpush3.bf16.msra.mxu1 %v3832_v43 }
 0xcc7   : > { %3556 = vmatprep.subr.bf16.mxu1 %v4543_v1 }
 0xcca   : > { %3557 = vmatpush3.bf16.msra.mxu1 %v3833_v3 }
 0xccb   : > { %3558 = vmatprep.subr.bf16.mxu1 %v4543_v1 }
 0xcce   : > { %3559 = vmatpush3.bf16.msra.mxu1 %v3834_v52 }
 0xccf   : > { %3560 = vmatprep.subr.bf16.mxu1 %v4543_v1  ;;  %v2805_v1 = vld [vmem:[%s5800_s22] sm:$0x1] }
 0xcd2   : > { %3561 = vmatpush3.bf16.msra.mxu1 %v3835_v53 }
 0xd88   : > { %v2674_v45 = vpop.f32.mrb[44].mxu1 }
 0xd89   : > { %v2675_v46 = vadd.f32 %v2674_v45, %v2624_v44  ;;  %v3524_v47 = vpop.f32.mrb[45].mxu1 }
 0xd8a   : > { %v2677_v48 = vpop.f32.mrb[46].mxu1 }
 0xd8b   : > { %v2680_v49 = vmax.f32 %v2675_v46, 0.0  ;;  %v3525_v50 = vpop.f32.mrb[47].mxu1 }
 0xd8d   : > { %v2681_v51 = vpack.c.bf16 %v2680_v49, %v2680_v49 }
 0xd8f   : > { %3543 = vmatmul.mubr.bf16.vlgmr.msra.gmra.mrb[48].mxu0 %v2681_v51 }
 0xe62   : > { %v2781_v56 = vpop.f32.mrb[48].mxu0 }
 0xe63   : > { %v2782_v57 = vadd.f32 %v2781_v56, %v2698_v55  ;;  %v3544_v58 = vpop.f32.mrb[49].mxu0 }
 0xe64   : > { %v2784_v59 = vpop.f32.mrb[50].mxu0 }
 0xe65   : > { %v2787_v60 = vmax.f32 %v2782_v57, 0.0  ;;  %v3545_v61 = vpop.f32.mrb[51].mxu0 }
 0xe67   : > { %v2788_v54 = vpack.c.bf16 %v2787_v60, %v2787_v60 }
 0xe69   : > { %3563 = vmatmul.mubr.bf16.vlgmr.msra.gmra.mrb[48].mxu1 %v2788_v54 }
 0xf3c   : > { %v2888_v62 = vpop.f32.mrb[48].mxu1 }
 0xf3d   : > { %v2889_v63 = vadd.f32 %v2888_v62, %v2805_v1  ;;  %v3564_v0 = vpop.f32.mrb[49].mxu1 }
 0xf3e   : > { %v2891_v2 = vpop.f32.mrb[50].mxu1 }
 0xf3f   : > { %2894 = vst [vmem:[%s1129_s27] sm:$0x1] %v2889_v63  ;;  %v3565_v4 = vpop.f32.mrb[51].mxu1 }
 0xf40   : > { %4431 = shalt.err (!%p4428_p4)
}
 0xf41   : > { %s4432_s7 = scalar_lea.hbm %s5592_s29, 16  ;;  %s4436_s10 = scalar_lea.hbm %s5802_s5, 32 }
 0xf42   : > { %p4433_p10 = scmp.ne.s32.totalorder %s5592_s29, %s4432_s7  ;;  %p4437_p8 = scmp.lt.u32.totalorder %s5592_s29, %s5802_s5 }
 0xf43   : > { %p4438_p0 = scmp.lt.u32.totalorder %s4436_s10, %s4432_s7  ;;  %p4440_p5 = scmp.lt.u32.totalorder %s4432_s7, %s5592_s29 }
 0xf44   : > { %p4434_p2 = pnand %p4433_p10, %p5803_p9 }
 0xf45   : > { %p4439_p3 = por %p4438_p0, %p4437_p8 }
 0xf46   : > { %p4435_p13 = pneg %p4434_p2 }
 0xf47   : > { %p4441_p6 = por %p4440_p5, %p4439_p3 }
 0xf49   : > { %p4442_p1 = pnand %p4441_p6, %p4435_p13 }
 0xf4b   : > { %4445 = shalt.err (!%p4442_p1)
}
 0xf4c   : > { %3636 = dma.vmem_to_hbm [thread:$0]  (%p5803_p9), %s5594_s15, 16, %s5592_s29, %s2896_s24  }
 0xf4d PF: > { %s5804_s27 = sld [smem:[#allocation45_spill]]  ;;  %s5805_s1 = sld [smem:[#allocation51_spill]] }
 0xf4e   : > { %p5807_p11 = scmp.ge.s32.totalorder %s4520_s9, 2 }
 0xf53   : > { %s2920_s20 = sand.u32 1, %s5804_s27   ;;  %p5806_p7 = scmp.ne.s32.totalorder %s5805_s1, 0 }
 0xf54   : > { %s2921_s0 = scalar_lea.sflag [#allocation5], %s2920_s20 }
 0xf55   : > { %p3698_p12 = pnand %p5807_p11, %p5806_p7 }
 0xf57   : > { %4503 = dma.done.wait (!%p3698_p12), %s2921_s0, 16  }
 0xf58   : > { %4505 = vsyncadd (!%p3698_p12), %s2921_s0, 4294967280  ;;  %s5808_s9 = sld [smem:[#allocation48_spill]]  ;;  %s5809_s25 = sld [smem:[#allocation46_spill]] }
 0xf59   : > { %s5810_s20 = sld [smem:[#allocation49_spill]]  ;;  %s5811_s8 = smov %s4512_s30 }
 0xf5e   : > { %p53_p4 = scmp.ge.s32.totalorder %s5808_s9, 4   ;;  %s5812_s30 = smov %s5809_s25 }
 0xf60   :  { %55 = sbr.rel (!%p53_p4) target bundleno = 39 (0x27), region = 264 }
 0xf67   :  { %2925 = vsyncpa [#allocation4], 1 }
 0xf68   :  { %2927 = vsyncpa [#allocation4 + $0x1], 1 }
 0xf69   :  { %2928 = vsyncpa [#allocation7], 1 }
 0xf6a   :  { %2930 = vsyncpa [#allocation7 + $0x1], 1 }
 0xf6b   :  { %2931 = vsyncpa [#allocation10], 1 }
 0xf6c   :  { %2932 = vsyncpa [#allocation13], 1 }
 0xf6d   :  { %2933 = vsyncpa [#allocation16], 1 }
 0xf6e   :  { %2934 = vsyncpa [#allocation19], 1 }
 0xf6f   :  { %2935 = vsyncpa [#allocation22], 1 }
 0xf70   :  { %2936 = vsyncpa [#allocation25], 1 }
 0xf71   :  { %2937 = vsyncpa [#allocation28], 1 }
 0xf72   :  { %2938 = vsyncpa [#allocation31], 1 }
 0xf73   :  { %2939 = vsyncpa [#allocation5], 1 }
 0xf74   :  { %2941 = vsyncpa [#allocation5 + $0x1], 1 }

</bundles_post_ra>
